<compile_context>
chip_gen: v7x
topology: tpu7x:2x2x1
jax: 0.10.0
libtpu: 0.0.40
codegen_flags: <defaults>
</compile_context>

<pallas_src>
import functools

import jax
import jax.numpy as jnp
from jax.experimental import pallas as pl
from jax.experimental.pallas import tpu as pltpu


LANE = 128
VMEM_LIMIT = 48 * 1024 * 1024          # < 64 MiB physical on v7x; fine on v5e/v6e
_RESIDENT_VMEM_BUDGET = 40 * 1024 * 1024  # regime-1 working-set cap (headroom kept)


def _round_up(v, m):
    return (v + m - 1) // m * m


def _node_pad(n):
    # Pad the node count so large graphs can use 512-wide row tiles.
    return _round_up(n, 512) if n >= 1024 else _round_up(n, 256)


def _pad_to(a, axis, target):
    pad = target - a.shape[axis]
    if pad <= 0:
        return a
    widths = [(0, 0)] * a.ndim
    widths[axis] = (0, pad)
    return jnp.pad(a, widths)


def _pick_tile(size, candidates, min_programs=1):
    for t in candidates:
        if size % t == 0 and size // t >= min_programs:
            return t
    return 128


# ---------------------------------------------------------------------------
# Graph glue (plain JAX): (A + I) built directly at padded size in bf16.
# Entries are exactly {0,1}; the degree normalization stays in f32 and is
# folded into the Pallas kernels instead of materializing a normalized A_hat.
# ---------------------------------------------------------------------------
def build_self_loop_adjacency(edge_index, num_nodes, n_pad):
    """Returns ((A+I) padded bf16, D^-1/2 as (n_pad, 1) f32).

    PyG GCNConv propagates messages src -> dst (out[dst] += norm * x[src]),
    so the dense operator row index is dst and the column index is src.
    """
    src, dst = edge_index[0], edge_index[1]
    adj = jnp.zeros((n_pad, n_pad), jnp.bfloat16)
    adj = adj.at[dst, src].set(1.0)
    diag = jnp.arange(num_nodes)
    adj = adj.at[diag, diag].set(1.0)                 # add remaining self loops
    deg = jnp.sum(adj, axis=1, dtype=jnp.float32)     # padded rows -> deg 0
    d_inv_sqrt = jnp.where(deg > 0.0, jax.lax.rsqrt(jnp.maximum(deg, 1.0)), 0.0)
    return adj, d_inv_sqrt.reshape(n_pad, 1)


# ---------------------------------------------------------------------------
# Kernel 1: scaled feature transform   out = D^-1/2 (X @ W)
# ---------------------------------------------------------------------------
def _xw_kernel(x_ref, w_ref, d_ref, o_ref):
    xw = jnp.dot(x_ref[...], w_ref[...], preferred_element_type=jnp.float32)
    o_ref[...] = (xw * d_ref[...]).astype(o_ref.dtype)


def feature_transform(x_bf16, w_bf16, d_inv_sqrt):
    """x: (N_pad, F_in) bf16, w: (F_in, F_pad) bf16, d: (N_pad, 1) f32."""
    n_pad, f_in = x_bf16.shape
    f_pad = w_bf16.shape[1]
    tm = _pick_tile(n_pad, (1024, 512, 256, 128), min_programs=1)
    cost = pl.CostEstimate(
        flops=2 * n_pad * f_in * f_pad,
        transcendentals=0,
        bytes_accessed=(n_pad * f_in * 2 + f_in * f_pad * 2
                        + n_pad * f_pad * 2 + n_pad * 4),
    )
    return pl.pallas_call(
        _xw_kernel,
        out_shape=jax.ShapeDtypeStruct((n_pad, f_pad), jnp.bfloat16),
        grid_spec=pltpu.PrefetchScalarGridSpec(
            num_scalar_prefetch=0,
            grid=(n_pad // tm,),
            in_specs=[
                pl.BlockSpec((tm, f_in), lambda i: (i, 0)),
                pl.BlockSpec((f_in, f_pad), lambda i: (0, 0)),
                pl.BlockSpec((tm, 1), lambda i: (i, 0)),
            ],
            out_specs=pl.BlockSpec((tm, f_pad), lambda i: (i, 0)),
        ),
        compiler_params=pltpu.CompilerParams(
            dimension_semantics=("parallel",),
            vmem_limit_bytes=VMEM_LIMIT,
        ),
        cost_estimate=cost,
    )(x_bf16, w_bf16, d_inv_sqrt)


# ---------------------------------------------------------------------------
# Kernel 2: aggregation   out = [relu]( D^-1/2 ((A+I) @ XW_scaled) + b )
# ---------------------------------------------------------------------------
def _agg_full_kernel(a_ref, xw_ref, d_ref, b_ref, o_ref, *, apply_relu):
    # Regime 1: full reduction in a single dot (A row panel + XW column panel
    # both VMEM-resident); no k axis, no scratch accumulator.
    acc = jnp.dot(a_ref[...], xw_ref[...], preferred_element_type=jnp.float32)
    out = acc * d_ref[...] + b_ref[...]
    if apply_relu:
        out = jnp.maximum(out, 0.0)
    o_ref[...] = out.astype(o_ref.dtype)


def _agg_tiled_kernel(a_ref, xw_ref, d_ref, b_ref, o_ref, acc_ref, *, apply_relu):
    # Regime 2 (large graphs): k-tiled reduction with f32 VMEM accumulator.
    k = pl.program_id(2)

    @pl.when(k == 0)
    def _():
        acc_ref[...] = jnp.zeros_like(acc_ref)

    acc_ref[...] += jnp.dot(a_ref[...], xw_ref[...],
                            preferred_element_type=jnp.float32)

    @pl.when(k == pl.num_programs(2) - 1)
    def _():
        out = acc_ref[...] * d_ref[...] + b_ref[...]
        if apply_relu:
            out = jnp.maximum(out, 0.0)
        o_ref[...] = out.astype(o_ref.dtype)


def aggregate(adj_bf16, xw_bf16, d_inv_sqrt, bias_f32, *, apply_relu, out_dtype):
    n_pad = adj_bf16.shape[0]
    f_pad = xw_bf16.shape[1]
    out_bytes = jnp.dtype(out_dtype).itemsize

    tn = _pick_tile(f_pad, (512, 256, 128), min_programs=1)
    tm = _pick_tile(n_pad, (512, 256, 128), min_programs=2)  # >=2 row programs

    # Regime 1 working set (double-buffered A row panel + resident XW panel).
    resident_bytes = (tm * n_pad * 2 * 2 + n_pad * tn * 2 * 2
                      + tm * tn * out_bytes * 2)
    use_full_rows = resident_bytes <= _RESIDENT_VMEM_BUDGET

    cost = pl.CostEstimate(
        flops=2 * n_pad * n_pad * f_pad,
        transcendentals=0,
        bytes_accessed=(n_pad * n_pad * 2 * (f_pad // tn)
                        + n_pad * f_pad * 2 + n_pad * f_pad * out_bytes
                        + n_pad * 4 + f_pad * 4),
    )

    if use_full_rows:
        kernel = functools.partial(_agg_full_kernel, apply_relu=apply_relu)
        grid_spec = pltpu.PrefetchScalarGridSpec(
            num_scalar_prefetch=0,
            grid=(f_pad // tn, n_pad // tm),            # j outer, i inner
            in_specs=[
                pl.BlockSpec((tm, n_pad), lambda j, i: (i, 0)),   # A row panel
                pl.BlockSpec((n_pad, tn), lambda j, i: (0, j)),   # XW resident
                pl.BlockSpec((tm, 1), lambda j, i: (i, 0)),       # D^-1/2 rows
                pl.BlockSpec((1, tn), lambda j, i: (0, j)),       # bias slab
            ],
            out_specs=pl.BlockSpec((tm, tn), lambda j, i: (i, j)),
        )
        semantics = ("parallel", "parallel")
    else:
        tk = _pick_tile(n_pad, (1024, 512, 256, 128), min_programs=1)
        kernel = functools.partial(_agg_tiled_kernel, apply_relu=apply_relu)
        grid_spec = pltpu.PrefetchScalarGridSpec(
            num_scalar_prefetch=0,
            grid=(f_pad // tn, n_pad // tm, n_pad // tk),
            in_specs=[
                pl.BlockSpec((tm, tk), lambda j, i, k: (i, k)),
                pl.BlockSpec((tk, tn), lambda j, i, k: (k, j)),
                pl.BlockSpec((tm, 1), lambda j, i, k: (i, 0)),
                pl.BlockSpec((1, tn), lambda j, i, k: (0, j)),
            ],
            out_specs=pl.BlockSpec((tm, tn), lambda j, i, k: (i, j)),
            scratch_shapes=[pltpu.VMEM((tm, tn), jnp.float32)],
        )
        semantics = ("parallel", "parallel", "arbitrary")

    return pl.pallas_call(
        kernel,
        out_shape=jax.ShapeDtypeStruct((n_pad, f_pad), out_dtype),
        grid_spec=grid_spec,
        compiler_params=pltpu.CompilerParams(
            dimension_semantics=semantics,
            vmem_limit_bytes=VMEM_LIMIT,
        ),
        cost_estimate=cost,
    )(adj_bf16, xw_bf16, d_inv_sqrt, bias_f32)


# ---------------------------------------------------------------------------
# GCNWrapper forward: (x, edge_index) -> logits (2-layer GCN)
# ---------------------------------------------------------------------------
def gcn_wrapper_forward(x, edge_index, params):
    n = x.shape[0]
    f_hid = params["w1"].shape[1]
    f_out = params["w2"].shape[1]

    n_pad = _node_pad(n)
    f_hid_pad = _round_up(f_hid, LANE)
    f_out_pad = _round_up(f_out, LANE)

    adj, d = build_self_loop_adjacency(edge_index, n, n_pad)

    x_p = _pad_to(x, 0, n_pad).astype(jnp.bfloat16)
    w1 = _pad_to(params["w1"], 1, f_hid_pad).astype(jnp.bfloat16)
    b1 = _pad_to(params["b1"], 0, f_hid_pad).astype(jnp.float32).reshape(1, -1)
    w2 = _pad_to(_pad_to(params["w2"], 0, f_hid_pad), 1, f_out_pad)
    w2 = w2.astype(jnp.bfloat16)
    b2 = _pad_to(params["b2"], 0, f_out_pad).astype(jnp.float32).reshape(1, -1)

    # Layer 1: H1 = relu( D^-1/2 (A+I) (D^-1/2 X W1) + b1 )
    xw1 = feature_transform(x_p, w1, d)
    h1 = aggregate(adj, xw1, d, b1, apply_relu=True, out_dtype=jnp.bfloat16)

    # Layer 2: Y = D^-1/2 (A+I) (D^-1/2 H1 W2) + b2
    xw2 = feature_transform(h1, w2, d)
    y = aggregate(adj, xw2, d, b2, apply_relu=False, out_dtype=jnp.float32)

    return y[:n, :f_out]


# ---------------------------------------------------------------------------
# References for the sanity check
# ---------------------------------------------------------------------------
def gcn_reference_f32(x, edge_index, params):
    n = x.shape[0]
    adj = jnp.zeros((n, n), jnp.float32).at[edge_index[1], edge_index[0]].set(1.0)
    adj = adj.at[jnp.arange(n), jnp.arange(n)].set(1.0)
    deg = jnp.sum(adj, axis=1)
    dis = jnp.where(deg > 0, jax.lax.rsqrt(jnp.maximum(deg, 1.0)), 0.0)
    a_hat = dis[:, None] * adj * dis[None, :]
    h1 = jnp.maximum(a_hat @ (x @ params["w1"]) + params["b1"], 0.0)
    return a_hat @ (h1 @ params["w2"]) + params["b2"]


def gcn_reference_bf16(x, edge_index, params):
    """Mirrors the kernel's bf16 operands / f32 accumulation / folded D^-1/2."""
    bf, f32 = jnp.bfloat16, jnp.float32
    n = x.shape[0]
    adj, d = build_self_loop_adjacency(edge_index, n, n)
    xw1 = (jnp.dot(x.astype(bf), params["w1"].astype(bf),
                   preferred_element_type=f32) * d).astype(bf)
    h1 = jnp.maximum(jnp.dot(adj, xw1, preferred_element_type=f32) * d
                     + params["b1"], 0.0).astype(bf)
    xw2 = (jnp.dot(h1, params["w2"].astype(bf),
                   preferred_element_type=f32) * d).astype(bf)
    return jnp.dot(adj, xw2, preferred_element_type=f32) * d + params["b2"]


if __name__ == "__main__":
    key = jax.random.PRNGKey(0)
    k_x, k_e, k_w1, k_w2 = jax.random.split(key, 4)

    N = 256         # nodes
    F_IN = 16       # input features
    F_HID = 32      # hidden features
    F_OUT = 8       # output classes
    E = 1024        # directed edges

    x = jax.random.normal(k_x, (N, F_IN), dtype=jnp.float32)
    edge_index = jax.random.randint(k_e, (2, E), 0, N, dtype=jnp.int32)

    params = {
        "w1": jax.random.normal(k_w1, (F_IN, F_HID), jnp.float32)
        * (1.0 / jnp.sqrt(F_IN)),
        "b1": jnp.zeros((F_HID,), jnp.float32),
        "w2": jax.random.normal(k_w2, (F_HID, F_OUT), jnp.float32)
        * (1.0 / jnp.sqrt(F_HID)),
        "b2": jnp.zeros((F_OUT,), jnp.float32),
    }

    ref_bf16 = gcn_reference_bf16(x, edge_index, params)
    ref_f32 = gcn_reference_f32(x, edge_index, params)

    # Default path: VMEM-resident (no k-axis) aggregation regime.
    out = jax.block_until_ready(jax.jit(gcn_wrapper_forward)(x, edge_index, params))
    assert out.shape == (N, F_OUT)
    assert jnp.allclose(out, ref_bf16, atol=2e-2, rtol=2e-2)
    assert jnp.allclose(out, ref_f32, atol=1e-1, rtol=1e-1)

    # Also exercise the large-graph k-tiled fallback on the same small inputs.
    _RESIDENT_VMEM_BUDGET = 0
    out_tiled = jax.block_until_ready(
        jax.jit(gcn_wrapper_forward)(x, edge_index, params))
    assert jnp.allclose(out_tiled, ref_bf16, atol=2e-2, rtol=2e-2)
    assert jnp.allclose(out_tiled, ref_f32, atol=1e-1, rtol=1e-1)

    print("KERNEL_OK")
</pallas_src>

<mosaic_0001>
module attributes {stable_mosaic.version = 11 : i64} {
  func.func @_xw_kernel(%arg0: i32, %arg1: memref<256x16xbf16, #tpu.memory_space<vmem>>, %arg2: memref<16x128xbf16, #tpu.memory_space<vmem>>, %arg3: memref<256x1xf32, #tpu.memory_space<vmem>>, %arg4: memref<256x128xbf16, #tpu.memory_space<vmem>>) attributes {dimension_semantics = [#tpu.dimension_semantics<parallel>], iteration_bounds = array<i64: 1>, scalar_prefetch = 0 : i64, scratch_operands = 0 : i64, tpu.core_type = #tpu.core_type<tc>, window_params = [{transform_indices = @transform_0, window_bounds = array<i64: 256, 16>}, {pipeline_mode = #tpu.pipeline_mode<synchronous>, transform_indices = @transform_1, window_bounds = array<i64: 16, 128>}, {transform_indices = @transform_2, window_bounds = array<i64: 256, 1>}, {transform_indices = @transform_3, window_bounds = array<i64: 256, 128>}]} {
    %c0 = arith.constant 0 : index
    %c0_0 = arith.constant 0 : index
    %0 = vector.load %arg1[%c0, %c0_0] : memref<256x16xbf16, #tpu.memory_space<vmem>>, vector<256x16xbf16>
    %c0_1 = arith.constant 0 : index
    %c0_2 = arith.constant 0 : index
    %1 = vector.load %arg2[%c0_1, %c0_2] : memref<16x128xbf16, #tpu.memory_space<vmem>>, vector<16x128xbf16>
    %cst = arith.constant dense<0.000000e+00> : vector<256x128xf32>
    %2 = tpu.matmul %0, %1, %cst {dimension_numbers = #tpu.dot_dimension_numbers<[1], [0], [0], [1], [0, 0, 1, 1], [], []>} : vector<256x16xbf16>, vector<16x128xbf16>, vector<256x128xf32> -> vector<256x128xf32>
    %c0_3 = arith.constant 0 : index
    %c0_4 = arith.constant 0 : index
    %3 = vector.load %arg3[%c0_3, %c0_4] : memref<256x1xf32, #tpu.memory_space<vmem>>, vector<256x1xf32>
    %4 = vector.broadcast %3 : vector<256x1xf32> to vector<256x128xf32>
    %5 = arith.mulf %2, %4 : vector<256x128xf32>
    %6 = arith.truncf %5 : vector<256x128xf32> to vector<256x128xbf16>
    %c0_5 = arith.constant 0 : index
    %c0_6 = arith.constant 0 : index
    %7 = vector.load %arg4[%c0_5, %c0_6] : memref<256x128xbf16, #tpu.memory_space<vmem>>, vector<256x128xbf16>
    tpu.vector_store %arg4[%c0_5, %c0_6], %6 {strides = array<i32>} : memref<256x128xbf16, #tpu.memory_space<vmem>>, vector<256x128xbf16>,
    return
  }
  func.func @transform_0(%arg0: i32) -> (i32, i32) {
    %c0_i32 = arith.constant 0 : i32
    %c0_i32_0 = arith.constant 0 : i32
    return %arg0, %c0_i32 : i32, i32
  }
  func.func @transform_1(%arg0: i32) -> (i32, i32) {
    %c0_i32 = arith.constant 0 : i32
    %c0_i32_0 = arith.constant 0 : i32
    %c0_i32_1 = arith.constant 0 : i32
    return %c0_i32, %c0_i32_0 : i32, i32
  }
  func.func @transform_2(%arg0: i32) -> (i32, i32) {
    %c0_i32 = arith.constant 0 : i32
    %c0_i32_0 = arith.constant 0 : i32
    return %arg0, %c0_i32 : i32, i32
  }
  func.func @transform_3(%arg0: i32) -> (i32, i32) {
    %c0_i32 = arith.constant 0 : i32
    %c0_i32_0 = arith.constant 0 : i32
    return %arg0, %c0_i32 : i32, i32
  }
}

module attributes {stable_mosaic.version = 11 : i64} {
  func.func @_agg_full_kernel(%arg0: i32, %arg1: i32, %arg2: memref<128x256xbf16, #tpu.memory_space<vmem>>, %arg3: memref<256x128xbf16, #tpu.memory_space<vmem>>, %arg4: memref<128x1xf32, #tpu.memory_space<vmem>>, %arg5: memref<1x128xf32, #tpu.memory_space<vmem>>, %arg6: memref<128x128xbf16, #tpu.memory_space<vmem>>) attributes {dimension_semantics = [#tpu.dimension_semantics<parallel>, #tpu.dimension_semantics<parallel>], iteration_bounds = array<i64: 1, 2>, scalar_prefetch = 0 : i64, scratch_operands = 0 : i64, tpu.core_type = #tpu.core_type<tc>, window_params = [{transform_indices = @transform_0, window_bounds = array<i64: 128, 256>}, {transform_indices = @transform_1, window_bounds = array<i64: 256, 128>}, {transform_indices = @transform_2, window_bounds = array<i64: 128, 1>}, {transform_indices = @transform_3, window_bounds = array<i64: 1, 128>}, {transform_indices = @transform_4, window_bounds = array<i64: 128, 128>}]} {
    %c0 = arith.constant 0 : index
    %c0_0 = arith.constant 0 : index
    %0 = vector.load %arg2[%c0, %c0_0] : memref<128x256xbf16, #tpu.memory_space<vmem>>, vector<128x256xbf16>
    %c0_1 = arith.constant 0 : index
    %c0_2 = arith.constant 0 : index
    %1 = vector.load %arg3[%c0_1, %c0_2] : memref<256x128xbf16, #tpu.memory_space<vmem>>, vector<256x128xbf16>
    %cst = arith.constant dense<0.000000e+00> : vector<128x128xf32>
    %2 = tpu.matmul %0, %1, %cst {dimension_numbers = #tpu.dot_dimension_numbers<[1], [0], [0], [1], [0, 0, 1, 1], [], []>} : vector<128x256xbf16>, vector<256x128xbf16>, vector<128x128xf32> -> vector<128x128xf32>
    %c0_3 = arith.constant 0 : index
    %c0_4 = arith.constant 0 : index
    %3 = vector.load %arg4[%c0_3, %c0_4] : memref<128x1xf32, #tpu.memory_space<vmem>>, vector<128x1xf32>
    %4 = vector.broadcast %3 : vector<128x1xf32> to vector<128x128xf32>
    %5 = arith.mulf %2, %4 : vector<128x128xf32>
    %c0_5 = arith.constant 0 : index
    %c0_6 = arith.constant 0 : index
    %6 = vector.load %arg5[%c0_5, %c0_6] : memref<1x128xf32, #tpu.memory_space<vmem>>, vector<1x128xf32>
    %7 = vector.broadcast %6 : vector<1x128xf32> to vector<128x128xf32>
    %8 = arith.addf %5, %7 : vector<128x128xf32>
    %cst_7 = arith.constant 0.000000e+00 : f32
    %9 = vector.broadcast %cst_7 : f32 to vector<128x128xf32>
    %10 = arith.maximumf %8, %9 : vector<128x128xf32>
    %11 = arith.truncf %10 : vector<128x128xf32> to vector<128x128xbf16>
    %c0_8 = arith.constant 0 : index
    %c0_9 = arith.constant 0 : index
    %12 = vector.load %arg6[%c0_8, %c0_9] : memref<128x128xbf16, #tpu.memory_space<vmem>>, vector<128x128xbf16>
    tpu.vector_store %arg6[%c0_8, %c0_9], %11 {strides = array<i32>} : memref<128x128xbf16, #tpu.memory_space<vmem>>, vector<128x128xbf16>,
    return
  }
  func.func @transform_0(%arg0: i32, %arg1: i32) -> (i32, i32) {
    %c0_i32 = arith.constant 0 : i32
    %c0_i32_0 = arith.constant 0 : i32
    return %arg1, %c0_i32 : i32, i32
  }
  func.func @transform_1(%arg0: i32, %arg1: i32) -> (i32, i32) {
    %c0_i32 = arith.constant 0 : i32
    %c0_i32_0 = arith.constant 0 : i32
    return %c0_i32, %arg0 : i32, i32
  }
  func.func @transform_2(%arg0: i32, %arg1: i32) -> (i32, i32) {
    %c0_i32 = arith.constant 0 : i32
    %c0_i32_0 = arith.constant 0 : i32
    return %arg1, %c0_i32 : i32, i32
  }
  func.func @transform_3(%arg0: i32, %arg1: i32) -> (i32, i32) {
    %c0_i32 = arith.constant 0 : i32
    %c0_i32_0 = arith.constant 0 : i32
    return %c0_i32, %arg0 : i32, i32
  }
  func.func @transform_4(%arg0: i32, %arg1: i32) -> (i32, i32) {
    %c0_i32 = arith.constant 0 : i32
    return %arg1, %arg0 : i32, i32
  }
}

module attributes {stable_mosaic.version = 11 : i64} {
  func.func @_xw_kernel(%arg0: i32, %arg1: memref<256x128xbf16, #tpu.memory_space<vmem>>, %arg2: memref<128x128xbf16, #tpu.memory_space<vmem>>, %arg3: memref<256x1xf32, #tpu.memory_space<vmem>>, %arg4: memref<256x128xbf16, #tpu.memory_space<vmem>>) attributes {dimension_semantics = [#tpu.dimension_semantics<parallel>], iteration_bounds = array<i64: 1>, scalar_prefetch = 0 : i64, scratch_operands = 0 : i64, tpu.core_type = #tpu.core_type<tc>, window_params = [{transform_indices = @transform_0, window_bounds = array<i64: 256, 128>}, {pipeline_mode = #tpu.pipeline_mode<synchronous>, transform_indices = @transform_1, window_bounds = array<i64: 128, 128>}, {transform_indices = @transform_2, window_bounds = array<i64: 256, 1>}, {transform_indices = @transform_3, window_bounds = array<i64: 256, 128>}]} {
    %c0 = arith.constant 0 : index
    %c0_0 = arith.constant 0 : index
    %0 = vector.load %arg1[%c0, %c0_0] : memref<256x128xbf16, #tpu.memory_space<vmem>>, vector<256x128xbf16>
    %c0_1 = arith.constant 0 : index
    %c0_2 = arith.constant 0 : index
    %1 = vector.load %arg2[%c0_1, %c0_2] : memref<128x128xbf16, #tpu.memory_space<vmem>>, vector<128x128xbf16>
    %cst = arith.constant dense<0.000000e+00> : vector<256x128xf32>
    %2 = tpu.matmul %0, %1, %cst {dimension_numbers = #tpu.dot_dimension_numbers<[1], [0], [0], [1], [0, 0, 1, 1], [], []>} : vector<256x128xbf16>, vector<128x128xbf16>, vector<256x128xf32> -> vector<256x128xf32>
    %c0_3 = arith.constant 0 : index
    %c0_4 = arith.constant 0 : index
    %3 = vector.load %arg3[%c0_3, %c0_4] : memref<256x1xf32, #tpu.memory_space<vmem>>, vector<256x1xf32>
    %4 = vector.broadcast %3 : vector<256x1xf32> to vector<256x128xf32>
    %5 = arith.mulf %2, %4 : vector<256x128xf32>
    %6 = arith.truncf %5 : vector<256x128xf32> to vector<256x128xbf16>
    %c0_5 = arith.constant 0 : index
    %c0_6 = arith.constant 0 : index
    %7 = vector.load %arg4[%c0_5, %c0_6] : memref<256x128xbf16, #tpu.memory_space<vmem>>, vector<256x128xbf16>
    tpu.vector_store %arg4[%c0_5, %c0_6], %6 {strides = array<i32>} : memref<256x128xbf16, #tpu.memory_space<vmem>>, vector<256x128xbf16>,
    return
  }
  func.func @transform_0(%arg0: i32) -> (i32, i32) {
    %c0_i32 = arith.constant 0 : i32
    %c0_i32_0 = arith.constant 0 : i32
    return %arg0, %c0_i32 : i32, i32
  }
  func.func @transform_1(%arg0: i32) -> (i32, i32) {
    %c0_i32 = arith.constant 0 : i32
    %c0_i32_0 = arith.constant 0 : i32
    %c0_i32_1 = arith.constant 0 : i32
    return %c0_i32, %c0_i32_0 : i32, i32
  }
  func.func @transform_2(%arg0: i32) -> (i32, i32) {
    %c0_i32 = arith.constant 0 : i32
    %c0_i32_0 = arith.constant 0 : i32
    return %arg0, %c0_i32 : i32, i32
  }
  func.func @transform_3(%arg0: i32) -> (i32, i32) {
    %c0_i32 = arith.constant 0 : i32
    %c0_i32_0 = arith.constant 0 : i32
    return %arg0, %c0_i32 : i32, i32
  }
}

module attributes {stable_mosaic.version = 11 : i64} {
  func.func @_agg_full_kernel(%arg0: i32, %arg1: i32, %arg2: memref<128x256xbf16, #tpu.memory_space<vmem>>, %arg3: memref<256x128xbf16, #tpu.memory_space<vmem>>, %arg4: memref<128x1xf32, #tpu.memory_space<vmem>>, %arg5: memref<1x128xf32, #tpu.memory_space<vmem>>, %arg6: memref<128x128xf32, #tpu.memory_space<vmem>>) attributes {dimension_semantics = [#tpu.dimension_semantics<parallel>, #tpu.dimension_semantics<parallel>], iteration_bounds = array<i64: 1, 2>, scalar_prefetch = 0 : i64, scratch_operands = 0 : i64, tpu.core_type = #tpu.core_type<tc>, window_params = [{transform_indices = @transform_0, window_bounds = array<i64: 128, 256>}, {transform_indices = @transform_1, window_bounds = array<i64: 256, 128>}, {transform_indices = @transform_2, window_bounds = array<i64: 128, 1>}, {transform_indices = @transform_3, window_bounds = array<i64: 1, 128>}, {transform_indices = @transform_4, window_bounds = array<i64: 128, 128>}]} {
    %c0 = arith.constant 0 : index
    %c0_0 = arith.constant 0 : index
    %0 = vector.load %arg2[%c0, %c0_0] : memref<128x256xbf16, #tpu.memory_space<vmem>>, vector<128x256xbf16>
    %c0_1 = arith.constant 0 : index
    %c0_2 = arith.constant 0 : index
    %1 = vector.load %arg3[%c0_1, %c0_2] : memref<256x128xbf16, #tpu.memory_space<vmem>>, vector<256x128xbf16>
    %cst = arith.constant dense<0.000000e+00> : vector<128x128xf32>
    %2 = tpu.matmul %0, %1, %cst {dimension_numbers = #tpu.dot_dimension_numbers<[1], [0], [0], [1], [0, 0, 1, 1], [], []>} : vector<128x256xbf16>, vector<256x128xbf16>, vector<128x128xf32> -> vector<128x128xf32>
    %c0_3 = arith.constant 0 : index
    %c0_4 = arith.constant 0 : index
    %3 = vector.load %arg4[%c0_3, %c0_4] : memref<128x1xf32, #tpu.memory_space<vmem>>, vector<128x1xf32>
    %4 = vector.broadcast %3 : vector<128x1xf32> to vector<128x128xf32>
    %5 = arith.mulf %2, %4 : vector<128x128xf32>
    %c0_5 = arith.constant 0 : index
    %c0_6 = arith.constant 0 : index
    %6 = vector.load %arg5[%c0_5, %c0_6] : memref<1x128xf32, #tpu.memory_space<vmem>>, vector<1x128xf32>
    %7 = vector.broadcast %6 : vector<1x128xf32> to vector<128x128xf32>
    %8 = arith.addf %5, %7 : vector<128x128xf32>
    %c0_7 = arith.constant 0 : index
    %c0_8 = arith.constant 0 : index
    %9 = vector.load %arg6[%c0_7, %c0_8] : memref<128x128xf32, #tpu.memory_space<vmem>>, vector<128x128xf32>
    tpu.vector_store %arg6[%c0_7, %c0_8], %8 {strides = array<i32>} : memref<128x128xf32, #tpu.memory_space<vmem>>, vector<128x128xf32>,
    return
  }
  func.func @transform_0(%arg0: i32, %arg1: i32) -> (i32, i32) {
    %c0_i32 = arith.constant 0 : i32
    %c0_i32_0 = arith.constant 0 : i32
    return %arg1, %c0_i32 : i32, i32
  }
  func.func @transform_1(%arg0: i32, %arg1: i32) -> (i32, i32) {
    %c0_i32 = arith.constant 0 : i32
    %c0_i32_0 = arith.constant 0 : i32
    return %c0_i32, %arg0 : i32, i32
  }
  func.func @transform_2(%arg0: i32, %arg1: i32) -> (i32, i32) {
    %c0_i32 = arith.constant 0 : i32
    %c0_i32_0 = arith.constant 0 : i32
    return %arg1, %c0_i32 : i32, i32
  }
  func.func @transform_3(%arg0: i32, %arg1: i32) -> (i32, i32) {
    %c0_i32 = arith.constant 0 : i32
    %c0_i32_0 = arith.constant 0 : i32
    return %c0_i32, %arg0 : i32, i32
  }
  func.func @transform_4(%arg0: i32, %arg1: i32) -> (i32, i32) {
    %c0_i32 = arith.constant 0 : i32
    return %arg1, %arg0 : i32, i32
  }
}

</mosaic_0001>

<bundles_post_ra>
// kernel: gcn_wrapper_forward.5
= control target key start
LH: loop header
LB: loop body
LE: loop exit
PB: predicated region body
PF: predicated region fallthrough
CT: control target
= control target key end

     0   :  { %s1270_s15 = smov 0   ;;  %s1272_s16 = smov 0   ;;  %s1440_s0 = inlined_call_operand.vmem [shape: bf16[256,256], index: 0, kind: input, shape index: {}]   ;;  %s1441_s1 = inlined_call_operand.vmem [shape: bf16[256,128], index: 1, kind: input, shape index: {}]   ;;  %s1442_s2 = inlined_call_operand.vmem [shape: f32[256,1], index: 2, kind: input, shape index: {}]   ;;  %s1443_s3 = inlined_call_operand.vmem [shape: f32[1,128], index: 3, kind: input, shape index: {}]   ;;  %s1444_s4 = inlined_call_operand.vmem [shape: bf16[256,128], index: 4, kind: output, shape index: {}]  }
   0x1   :  { %s1274_s17 = smov 0  }
   0x2 LB: > { %s23_s18 = sadd.s32 1, %s1238_s16  ;;  %p950_p0 = scmp.ge.s32.totalorder %s1242_s17, 1  ;;  %s1242_s17 = sphi %s1274_s17, %s14_s17   ;;  %s1238_s16 = sphi %s1272_s16, %s1446_s16   ;;  %s1234_s15 = sphi %s1270_s15, %s1445_s15  }
   0x3   : > { %p24_p1 = scmp.ge.s32.totalorder %s23_s18, 2  ;;  %p206_p2 = scmp.lt.s32.totalorder %s1242_s17, 3 }
   0x5   : > { %s1448_s18 = smov (%p24_p1, %s23_s18), 0  ;;  %p207_p3 = pnand %p950_p0, %p206_p2 }
   0x6   : > { %v1180_v0 = vld [vmem:[%s1441_s1 + $0x40] sm:$0xff] (!%p207_p3)   ;;  %s951_s21 = sshll.u32 (!%p207_p3), %s1234_s15, 4  ;;  %v1182_v2 = vld [vmem:[%s1441_s1 + $0x48] sm:$0xff] (!%p207_p3)   ;;  %v1184_v4 = vld [vmem:[%s1441_s1 + $0x50] sm:$0xff] (!%p207_p3)   ;;  %v1244_v5 = vmov (!%p207_p3), 0  }
   0x7   : > { %210 = sbr.rel (%p207_p3) target bundleno = 290 (0x122), region = 36  ;;  %v1181_v1 = vld [vmem:[%s1441_s1] sm:$0xff] (!%p207_p3)   ;;  %1073 = vmatprep.subr.bf16.mxu0 (!%p207_p3), %v1180_v0  ;;  %1137 = vmatprep.subr.bf16.mxu1 (!%p207_p3), %v1180_v0  ;;  %v1183_v3 = vld [vmem:[%s1441_s1 + $0x8] sm:$0xff] (!%p207_p3)   ;;  %p249_p4 = scmp.lt.s32.totalorder (!%p207_p3), %s951_s21, 31  ;;  %v1185_v6 = vld [vmem:[%s1441_s1 + $0x10] sm:$0xff] (!%p207_p3)  }
   0x8   : > { %1074 = vmatpush3.bf16.msra.mxu0 (!%p207_p3), %v1181_v1  ;;  %1145 = vmatpush3.bf16.msra.mxu1 (!%p207_p3), %v1181_v1  ;;  %v1186_v7 = vld [vmem:[%s1441_s1 + $0x58] sm:$0xff] (!%p207_p3)   ;;  %v1188_v9 = vld [vmem:[%s1441_s1 + $0x60] sm:$0xff] (!%p207_p3)   ;;  %v1190_v11 = vld [vmem:[%s1441_s1 + $0x68] sm:$0xff] (!%p207_p3)  }
   0x9   : > { %1075 = vmatprep.subr.bf16.mxu0 (!%p207_p3), %v1182_v2  ;;  %1138 = vmatprep.subr.bf16.mxu1 (!%p207_p3), %v1182_v2  ;;  %v1187_v8 = vld [vmem:[%s1441_s1 + $0x18] sm:$0xff] (!%p207_p3)   ;;  %v1189_v10 = vld [vmem:[%s1441_s1 + $0x20] sm:$0xff] (!%p207_p3)   ;;  %v1191_v14 = vld [vmem:[%s1441_s1 + $0x28] sm:$0xff] (!%p207_p3)  }
   0xa   : > { %1179 = vset.pattern.permute.xlu1 (!%p207_p3), %v1244_v5  ;;  %1178 = vset.pattern.permute.xlu0 (!%p207_p3), %v1244_v5  ;;  %v1192_v15 = vld [vmem:[%s1441_s1 + $0x70] sm:$0xff] (!%p207_p3)   ;;  %v1194_v17 = vld [vmem:[%s1441_s1 + $0x78] sm:$0xff] (!%p207_p3)   ;;  %v1395_v2 = vld [vmem:[%s1443_s3] ss:$0 sm:$0xff] (!%p207_p3) }
   0xb   : > { %v1193_v16 = vld [vmem:[%s1441_s1 + $0x30] sm:$0xff] (!%p207_p3)   ;;  %v1195_v19 = vld [vmem:[%s1441_s1 + $0x38] sm:$0xff] (!%p207_p3)  }
   0xc   : > { %1076 = vmatpush3.bf16.msra.mxu0 (!%p207_p3), %v1183_v3  ;;  %1146 = vmatpush3.bf16.msra.mxu1 (!%p207_p3), %v1183_v3 }
   0xd   : > { %1077 = vmatprep.subr.bf16.mxu0 (!%p207_p3), %v1184_v4  ;;  %1139 = vmatprep.subr.bf16.mxu1 (!%p207_p3), %v1184_v4 }
   0xe   : > { %s1450_s21 = smov (!%p249_p4, %s951_s21), 31 }
   0xf   : > { %s1009_s10 = sshll.u32 %s1450_s21, 3  ;;  %s957_s13 = sshll.u32 %s1450_s21, 2 }
  0x10   : > { %1078 = vmatpush3.bf16.msra.mxu0 %v1185_v6  ;;  %1147 = vmatpush3.bf16.msra.mxu1 %v1185_v6  ;;  %s1324_s15 = scalar_lea.vmem %s1440_s0, %s1009_s10  ;;  %s1346_s6 = scalar_lea.vmem %s1442_s2, %s1009_s10 }
  0x11   : > { %1079 = vmatprep.subr.bf16.mxu0 %v1186_v7  ;;  %1140 = vmatprep.subr.bf16.mxu1 %v1186_v7  ;;  %v1198_v12 = vld [vmem:[%s1324_s15 + $0x4] ss:$8 sps:$4 sm:$0xff]   ;;  %v601_v18 = vld [vmem:[%s1346_s6 + $0x10] sm:$0xff]  ;;  %v1196_v21 = vld [vmem:[%s1324_s15] ss:$8 sps:$4 sm:$0xff]   ;;  %s1405_s21 = scalar_lea.vmem %s1444_s4, %s957_s13 }
  0x12   : > { %v1201_v13 = vld [vmem:[%s1324_s15 + $0x44] ss:$8 sps:$4 sm:$0xff]   ;;  %534 = vmatprep.mubr.bf16.mxu0 %v1198_v12  ;;  %627 = vperm.xlu1 %1179, %v601_v18   ;;  %v1199_v22 = vld [vmem:[%s1324_s15 + $0x40] ss:$8 sps:$4 sm:$0xff]   ;;  %v602_v23 = vld [vmem:[%s1346_s6 + $0x18] sm:$0xff] }
  0x13   : > { %566 = vmatprep.mubr.bf16.mxu1 %v1201_v13  ;;  %v599_v20 = vld [vmem:[%s1346_s6] sm:$0xff]  ;;  %v600_v24 = vld [vmem:[%s1346_s6 + $0x8] sm:$0xff]  ;;  %v1202_v25 = vld [vmem:[%s1324_s15 + $0x14] ss:$8 sps:$4 sm:$0xff]  }
  0x14   : > { %1080 = vmatpush3.bf16.msra.mxu0 %v1187_v8  ;;  %1148 = vmatpush3.bf16.msra.mxu1 %v1187_v8  ;;  %v1204_v26 = vld [vmem:[%s1324_s15 + $0x54] ss:$8 sps:$4 sm:$0xff]   ;;  %v604_v27 = vld [vmem:[%s1346_s6 + $0x28] sm:$0xff]  ;;  %v603_v28 = vld [vmem:[%s1346_s6 + $0x20] sm:$0xff] }
  0x15   : > { %1081 = vmatprep.subr.bf16.mxu0 %v1188_v9  ;;  %1141 = vmatprep.subr.bf16.mxu1 %v1188_v9  ;;  %v1206_v29 = vld [vmem:[%s1324_s15 + $0x10] ss:$8 sps:$4 sm:$0xff]   ;;  %v1208_v33 = vld [vmem:[%s1324_s15 + $0x24] ss:$8 sps:$4 sm:$0xff]   ;;  %v1212_v37 = vld [vmem:[%s1324_s15 + $0x20] ss:$8 sps:$4 sm:$0xff]  }
  0x16   : > { %617 = vperm.xlu0 %1178, %v599_v20   ;;  %632 = vperm.xlu1 %1179, %v602_v23   ;;  %v1207_v30 = vld [vmem:[%s1324_s15 + $0x50] ss:$8 sps:$4 sm:$0xff]   ;;  %v1210_v34 = vld [vmem:[%s1324_s15 + $0x64] ss:$8 sps:$4 sm:$0xff]   ;;  %v1213_v38 = vld [vmem:[%s1324_s15 + $0x60] ss:$8 sps:$4 sm:$0xff]  }
  0x17   : > { %v606_v31 = vld [vmem:[%s1346_s6 + $0x38] sm:$0xff]  ;;  %v605_v32 = vld [vmem:[%s1346_s6 + $0x30] sm:$0xff]  ;;  %v608_v35 = vld [vmem:[%s1346_s6 + $0x48] sm:$0xff] }
  0x18   : > { %1082 = vmatpush3.bf16.msra.mxu0 %v1189_v10  ;;  %1149 = vmatpush3.bf16.msra.mxu1 %v1189_v10  ;;  %v607_v36 = vld [vmem:[%s1346_s6 + $0x40] sm:$0xff]  ;;  %v610_v39 = vld [vmem:[%s1346_s6 + $0x58] sm:$0xff]  ;;  %v609_v40 = vld [vmem:[%s1346_s6 + $0x50] sm:$0xff] }
  0x19   : > { %1083 = vmatprep.subr.bf16.mxu0 %v1190_v11  ;;  %1142 = vmatprep.subr.bf16.mxu1 %v1190_v11  ;;  %v1214_v41 = vld [vmem:[%s1324_s15 + $0x34] ss:$8 sps:$4 sm:$0xff]   ;;  %v612_v43 = vld [vmem:[%s1346_s6 + $0x68] sm:$0xff]  ;;  %v611_v44 = vld [vmem:[%s1346_s6 + $0x60] sm:$0xff] }
  0x1a   : > { %622 = vperm.xlu0 %1178, %v600_v24   ;;  %642 = vperm.xlu1 %1179, %v604_v27   ;;  %v1216_v42 = vld [vmem:[%s1324_s15 + $0x74] ss:$8 sps:$4 sm:$0xff]   ;;  %v1218_v45 = vld [vmem:[%s1324_s15 + $0x30] ss:$8 sps:$4 sm:$0xff]  }
  0x1b   : > { %v1219_v46 = vld [vmem:[%s1324_s15 + $0x70] ss:$8 sps:$4 sm:$0xff]  }
  0x1c   : > { %1084 = vmatpush3.bf16.msra.mxu0 %v1191_v14  ;;  %1150 = vmatpush3.bf16.msra.mxu1 %v1191_v14  ;;  %v614_v47 = vld [vmem:[%s1346_s6 + $0x78] sm:$0xff]  ;;  %v613_v48 = vld [vmem:[%s1346_s6 + $0x70] sm:$0xff] }
  0x1d   : > { %1085 = vmatprep.subr.bf16.mxu0 %v1192_v15  ;;  %1143 = vmatprep.subr.bf16.mxu1 %v1192_v15 }
  0x1e   : > { %637 = vperm.xlu0 %1178, %v603_v28   ;;  %652 = vperm.xlu1 %1179, %v606_v31  }
  0x20   : > { %1086 = vmatpush3.bf16.msra.mxu0 %v1193_v16  ;;  %1151 = vmatpush3.bf16.msra.mxu1 %v1193_v16 }
  0x21   : > { %1087 = vmatprep.subr.bf16.mxu0 %v1194_v17  ;;  %1144 = vmatprep.subr.bf16.mxu1 %v1194_v17 }
  0x22   : > { %647 = vperm.xlu0 %1178, %v605_v32   ;;  %662 = vperm.xlu1 %1179, %v608_v35  }
  0x24   : > { %1088 = vmatpush3.bf16.msra.mxu0 %v1195_v19  ;;  %1152 = vmatpush3.bf16.msra.mxu1 %v1195_v19 }
  0x26   : > { %657 = vperm.xlu0 %1178, %v607_v36   ;;  %672 = vperm.xlu1 %1179, %v610_v39  }
  0x27   : > { %535 = vmatmul.mubr.bf16.vlgmr.msra.gmra.mrb[0].mxu0 %v1196_v21  ;;  %567 = vmatmul.mubr.bf16.vlgmr.msra.gmra.mrb[0].mxu1 %v1199_v22 }
  0x28   : > { %542 = vmatprep.mubr.bf16.mxu0 %v1202_v25  ;;  %574 = vmatprep.mubr.bf16.mxu1 %v1204_v26 }
  0x2a   : > { %667 = vperm.xlu0 %1178, %v609_v40   ;;  %682 = vperm.xlu1 %1179, %v612_v43  }
  0x2e   : > { %677 = vperm.xlu0 %1178, %v611_v44   ;;  %692 = vperm.xlu1 %1179, %v614_v47  }
  0x2f   : > { %543 = vmatmul.mubr.bf16.gmra.mrb[4].mxu0 %v1206_v29  ;;  %575 = vmatmul.mubr.bf16.gmra.mrb[4].mxu1 %v1207_v30 }
  0x30   : > { %550 = vmatprep.mubr.bf16.mxu0 %v1208_v33  ;;  %582 = vmatprep.mubr.bf16.mxu1 %v1210_v34 }
  0x32   : > { %687 = vperm.xlu0 %1178, %v613_v48  }
  0x37   : > { %551 = vmatmul.mubr.bf16.gmra.mrb[8].mxu0 %v1212_v37  ;;  %583 = vmatmul.mubr.bf16.gmra.mrb[8].mxu1 %v1213_v38 }
  0x38   : > { %558 = vmatprep.mubr.bf16.mxu0 %v1214_v41  ;;  %590 = vmatprep.mubr.bf16.mxu1 %v1216_v42 }
  0x3f   : > { %559 = vmatmul.mubr.bf16.gmra.mrb[12].mxu0 %v1218_v45  ;;  %591 = vmatmul.mubr.bf16.gmra.mrb[12].mxu1 %v1219_v46 }
  0x91   : > { %v628_v50 = vpop.permute.xlu1 %627 }
  0x95   : > { %v618_v49 = vpop.permute.xlu0 %617  ;;  %v633_v52 = vpop.permute.xlu1 %632 }
  0x99   : > { %v623_v51 = vpop.permute.xlu0 %622  ;;  %v1386_v54 = vpop.permute.xlu1 %642 }
  0x9d   : > { %v1384_v53 = vpop.permute.xlu0 %637  ;;  %v1390_v56 = vpop.permute.xlu1 %652 }
  0xa1   : > { %v1388_v55 = vpop.permute.xlu0 %647  ;;  %v663_v9 = vpop.permute.xlu1 %662 }
  0xa5   : > { %v658_v57 = vpop.permute.xlu0 %657  ;;  %v673_v37 = vpop.permute.xlu1 %672 }
  0xa9   : > { %v668_v14 = vpop.permute.xlu0 %667 }
  0xad   : > { %v678_v38 = vpop.permute.xlu0 %677 }
  0xfa   : > { %v1089_v58 = vpop.f32.mrb[0].mxu0  ;;  %v1113_v59 = vpop.f32.mrb[0].mxu1 }
  0xfb   : > { %v1090_v60 = vpop.f32.mrb[1].mxu0  ;;  %v1114_v61 = vpop.f32.mrb[1].mxu1 }
  0xfc   : > { %v1091_v62 = vadd.f32 %v1090_v60, %v1089_v58  ;;  %v1115_v63 = vadd.f32 %v1114_v61, %v1113_v59  ;;  %v1092_v0 = vpop.f32.mrb[2].mxu0  ;;  %v1116_v1 = vpop.f32.mrb[2].mxu1 }
  0xfd   : > { %v1093_v3 = vpop.f32.mrb[3].mxu0  ;;  %v1117_v4 = vpop.f32.mrb[3].mxu1 }
  0xfe   : > { %v695_v5 = vmul.f32 %v1091_v62, %v618_v49  ;;  %v703_v6 = vmul.f32 %v1115_v63, %v658_v57  ;;  %v1094_v7 = vadd.f32 %v1093_v3, %v1092_v0  ;;  %v1118_v8 = vadd.f32 %v1117_v4, %v1116_v1  ;;  %v683_v4 = vpop.permute.xlu1 %682 }
 0x100   : > { %v718_v10 = vadd.f32 %v1395_v2, %v695_v5  ;;  %v726_v11 = vadd.f32 %v1395_v2, %v703_v6  ;;  %v696_v12 = vmul.f32 %v1094_v7, %v623_v51  ;;  %v704_v13 = vmul.f32 %v1118_v8, %v663_v9 }
 0x102   : > { %v719_v15 = vadd.f32 %v1395_v2, %v696_v12  ;;  %v727_v16 = vadd.f32 %v1395_v2, %v704_v13  ;;  %v1095_v17 = vpop.f32.mrb[4].mxu0  ;;  %v1119_v18 = vpop.f32.mrb[4].mxu1  ;;  %v734_v19 = vmax.f32 %v718_v10, 0.0  ;;  %v742_v20 = vmax.f32 %v726_v11, 0.0 }
 0x103   : > { %v1096_v21 = vpop.f32.mrb[5].mxu0  ;;  %v1120_v22 = vpop.f32.mrb[5].mxu1 }
 0x104   : > { %v735_v23 = vmax.f32 %v719_v15, 0.0  ;;  %v743_v24 = vmax.f32 %v727_v16, 0.0  ;;  %v1097_v25 = vadd.f32 %v1096_v21, %v1095_v17  ;;  %v1121_v26 = vadd.f32 %v1120_v22, %v1119_v18  ;;  %v1098_v27 = vpop.f32.mrb[6].mxu0  ;;  %v1122_v28 = vpop.f32.mrb[6].mxu1 }
 0x105   : > { %v1099_v29 = vpop.f32.mrb[7].mxu0  ;;  %v1123_v30 = vpop.f32.mrb[7].mxu1 }
 0x106   : > { %v1029_v31 = vpack.c.bf16 %v735_v23, %v734_v19  ;;  %v1049_v32 = vpack.c.bf16 %v743_v24, %v742_v20  ;;  %v697_v33 = vmul.f32 %v1097_v25, %v628_v50  ;;  %v705_v34 = vmul.f32 %v1121_v26, %v668_v14  ;;  %v688_v11 = vpop.permute.xlu0 %687 }
 0x107   : > { %v1100_v35 = vadd.f32 %v1099_v29, %v1098_v27  ;;  %v1124_v36 = vadd.f32 %v1123_v30, %v1122_v28 }
 0x108   : > { %1030 = vst [vmem:[%s1405_s21] sm:$0xff] %v1029_v31   ;;  %1069 = vst [vmem:[%s1405_s21 + $0x20] sm:$0xff] %v1049_v32   ;;  %v720_v39 = vadd.f32 %v1395_v2, %v697_v33  ;;  %v728_v40 = vadd.f32 %v1395_v2, %v705_v34  ;;  %v693_v32 = vpop.permute.xlu1 %692 }
 0x109   : > { %v698_v41 = vmul.f32 %v1100_v35, %v633_v52  ;;  %v706_v42 = vmul.f32 %v1124_v36, %v673_v37 }
 0x10a   : > { %v1101_v43 = vpop.f32.mrb[8].mxu0  ;;  %v1125_v44 = vpop.f32.mrb[8].mxu1  ;;  %v736_v58 = vmax.f32 %v720_v39, 0.0  ;;  %v744_v59 = vmax.f32 %v728_v40, 0.0 }
 0x10b   : > { %v721_v45 = vadd.f32 %v1395_v2, %v698_v41  ;;  %v729_v46 = vadd.f32 %v1395_v2, %v706_v42  ;;  %v1102_v47 = vpop.f32.mrb[9].mxu0  ;;  %v1126_v48 = vpop.f32.mrb[9].mxu1 }
 0x10c   : > { %v1103_v49 = vadd.f32 %v1102_v47, %v1101_v43  ;;  %v1127_v50 = vadd.f32 %v1126_v48, %v1125_v44  ;;  %v1104_v51 = vpop.f32.mrb[10].mxu0  ;;  %v1128_v57 = vpop.f32.mrb[10].mxu1 }
 0x10d   : > { %v737_v60 = vmax.f32 %v721_v45, 0.0  ;;  %v745_v61 = vmax.f32 %v729_v46, 0.0  ;;  %v1105_v52 = vpop.f32.mrb[11].mxu0  ;;  %v1129_v62 = vpop.f32.mrb[11].mxu1 }
 0x10e   : > { %v699_v63 = vmul.f32 %v1103_v49, %v1384_v53  ;;  %v707_v0 = vmul.f32 %v1127_v50, %v678_v38  ;;  %v1106_v1 = vadd.f32 %v1105_v52, %v1104_v51  ;;  %v1130_v3 = vadd.f32 %v1129_v62, %v1128_v57 }
 0x10f   : > { %v1034_v5 = vpack.c.bf16 %v737_v60, %v736_v58  ;;  %v1054_v6 = vpack.c.bf16 %v745_v61, %v744_v59 }
 0x110   : > { %v722_v7 = vadd.f32 %v1395_v2, %v699_v63  ;;  %v730_v8 = vadd.f32 %v1395_v2, %v707_v0  ;;  %v700_v9 = vmul.f32 %v1106_v1, %v1386_v54  ;;  %v708_v10 = vmul.f32 %v1130_v3, %v683_v4 }
 0x111   : > { %1066 = vst [vmem:[%s1405_s21 + $0x8] sm:$0xff] %v1034_v5   ;;  %1070 = vst [vmem:[%s1405_s21 + $0x28] sm:$0xff] %v1054_v6  }
 0x112   : > { %v723_v12 = vadd.f32 %v1395_v2, %v700_v9  ;;  %v731_v53 = vadd.f32 %v1395_v2, %v708_v10  ;;  %v1107_v13 = vpop.f32.mrb[12].mxu0  ;;  %v1131_v14 = vpop.f32.mrb[12].mxu1  ;;  %v738_v15 = vmax.f32 %v722_v7, 0.0  ;;  %v746_v16 = vmax.f32 %v730_v8, 0.0 }
 0x113   : > { %v1108_v17 = vpop.f32.mrb[13].mxu0  ;;  %v1132_v18 = vpop.f32.mrb[13].mxu1 }
 0x114   : > { %v739_v19 = vmax.f32 %v723_v12, 0.0  ;;  %v747_v20 = vmax.f32 %v731_v53, 0.0  ;;  %v1109_v21 = vadd.f32 %v1108_v17, %v1107_v13  ;;  %v1133_v54 = vadd.f32 %v1132_v18, %v1131_v14  ;;  %v1110_v22 = vpop.f32.mrb[14].mxu0  ;;  %v1134_v23 = vpop.f32.mrb[14].mxu1 }
 0x115   : > { %v1111_v24 = vpop.f32.mrb[15].mxu0  ;;  %v1135_v25 = vpop.f32.mrb[15].mxu1 }
 0x116   : > { %v1039_v26 = vpack.c.bf16 %v739_v19, %v738_v15  ;;  %v1059_v27 = vpack.c.bf16 %v747_v20, %v746_v16  ;;  %v701_v28 = vmul.f32 %v1109_v21, %v1388_v55  ;;  %v709_v29 = vmul.f32 %v1133_v54, %v688_v11 }
 0x117   : > { %v1112_v30 = vadd.f32 %v1111_v24, %v1110_v22  ;;  %v1136_v31 = vadd.f32 %v1135_v25, %v1134_v23 }
 0x118   : > { %1067 = vst [vmem:[%s1405_s21 + $0x10] sm:$0xff] %v1039_v26   ;;  %1071 = vst [vmem:[%s1405_s21 + $0x30] sm:$0xff] %v1059_v27   ;;  %v724_v33 = vadd.f32 %v1395_v2, %v701_v28  ;;  %v732_v34 = vadd.f32 %v1395_v2, %v709_v29 }
 0x119   : > { %v702_v35 = vmul.f32 %v1112_v30, %v1390_v56  ;;  %v710_v36 = vmul.f32 %v1136_v31, %v693_v32 }
 0x11a   : > { %v740_v55 = vmax.f32 %v724_v33, 0.0  ;;  %v748_v39 = vmax.f32 %v732_v34, 0.0 }
 0x11b   : > { %v725_v37 = vadd.f32 %v1395_v2, %v702_v35  ;;  %v733_v38 = vadd.f32 %v1395_v2, %v710_v36 }
 0x11d   : > { %v741_v40 = vmax.f32 %v725_v37, 0.0  ;;  %v749_v41 = vmax.f32 %v733_v38, 0.0 }
 0x11f   : > { %v1044_v42 = vpack.c.bf16 %v741_v40, %v740_v55  ;;  %v1064_v43 = vpack.c.bf16 %v749_v41, %v748_v39 }
 0x121   : > { %1068 = vst [vmem:[%s1405_s21 + $0x18] sm:$0xff] %v1044_v42   ;;  %1072 = vst [vmem:[%s1405_s21 + $0x38] sm:$0xff] %v1064_v43  }
 0x122 PF: > { %s14_s17 = sadd.s32 1, %s1242_s17   ;;  %s1445_s15 = smov %s1238_s16 }
 0x123   : > { %p11_p5 = scmp.ge.s32.totalorder %s14_s17, 4   ;;  %s1446_s16 = smov %s1448_s18 }
 0x125   :  { %13 = sbr.rel (!%p11_p5) target bundleno = 2 (0x2), region = 75 }

// kernel: gcn_wrapper_forward.4
= control target key start
LH: loop header
LB: loop body
LE: loop exit
PB: predicated region body
PF: predicated region fallthrough
CT: control target
= control target key end

     0   :  { %v998_v0 = vmov 0   ;;  %vm135_vm0 = vcmask 130048   ;;  %s1260_s2 = inlined_call_operand.vmem [shape: f32[256,1], index: 2, kind: input, shape index: {}]   ;;  %s1261_s1 = inlined_call_operand.vmem [shape: bf16[16,128], index: 1, kind: input, shape index: {}]   ;;  %s1262_s0 = inlined_call_operand.vmem [shape: bf16[256,16], index: 0, kind: input, shape index: {}]   ;;  %s1263_s3 = inlined_call_operand.vmem [shape: bf16[256,128], index: 3, kind: output, shape index: {}]  }
   0x1   :  { %980 = vset.pattern.permute.xlu1 %v998_v0  ;;  %979 = vset.pattern.permute.xlu0 %v998_v0  ;;  %v347_v1 = vld [vmem:[%s1260_s2 + $0x10] sm:$0xff]  ;;  %v345_v2 = vld [vmem:[%s1260_s2] sm:$0xff]  ;;  %v348_v4 = vld [vmem:[%s1260_s2 + $0x18] sm:$0xff] }
   0x2   :  { %389 = vperm.xlu1 %980, %v347_v1   ;;  %379 = vperm.xlu0 %979, %v345_v2   ;;  %v981_v3 = vld [vmem:[%s1261_s1] sm:$0xff]   ;;  %v346_v5 = vld [vmem:[%s1260_s2 + $0x8] sm:$0xff]  ;;  %v352_v12 = vld [vmem:[%s1260_s2 + $0x38] sm:$0xff] }
   0x3   :  { %942 = vmatprep.subr.bf16.mxu0 %v981_v3  ;;  %976 = vmatprep.subr.bf16.mxu1 %v981_v3  ;;  %v982_v6 = vld [vmem:[%s1262_s0] sm:$0xff]   ;;  %v984_v8 = vld [vmem:[%s1262_s0 + $0x8] sm:$0xff]   ;;  %v986_v13 = vld [vmem:[%s1262_s0 + $0x10] sm:$0xff]  }
   0x4   :  { %943 = vmatpush3.bf16.msra.mxu0 %v981_v3  ;;  %977 = vmatpush3.bf16.msra.mxu1 %v981_v3  ;;  %v983_v7 = vld [vmem:[%s1262_s0 + $0x40] sm:$0xff]   ;;  %v985_v9 = vld [vmem:[%s1262_s0 + $0x48] sm:$0xff]   ;;  %v987_v14 = vld [vmem:[%s1262_s0 + $0x50] sm:$0xff]  }
   0x5   :  { %944 = vmatprep.mubr.msk.bf16.mxu0 %vm135_vm0, %v982_v6  ;;  %960 = vmatprep.mubr.msk.bf16.mxu1 %vm135_vm0, %v983_v7  ;;  %v350_v10 = vld [vmem:[%s1260_s2 + $0x28] sm:$0xff]  ;;  %v349_v11 = vld [vmem:[%s1260_s2 + $0x20] sm:$0xff]  ;;  %v351_v15 = vld [vmem:[%s1260_s2 + $0x30] sm:$0xff] }
   0x6   :  { %394 = vperm.xlu1 %980, %v348_v4   ;;  %384 = vperm.xlu0 %979, %v346_v5   ;;  %v988_v16 = vld [vmem:[%s1262_s0 + $0x18] sm:$0xff]   ;;  %v354_v18 = vld [vmem:[%s1260_s2 + $0x48] sm:$0xff]  ;;  %v353_v19 = vld [vmem:[%s1260_s2 + $0x40] sm:$0xff] }
   0x7   :  { %945 = vmatmul.mubr.msk.bf16.vlgmr.msra.gmra.mrb[0].mxu0 %vm135_vm0, %v984_v8  ;;  %961 = vmatmul.mubr.msk.bf16.vlgmr.msra.gmra.mrb[0].mxu1 %vm135_vm0, %v985_v9  ;;  %v989_v17 = vld [vmem:[%s1262_s0 + $0x58] sm:$0xff]   ;;  %v990_v20 = vld [vmem:[%s1262_s0 + $0x20] sm:$0xff]   ;;  %v355_v23 = vld [vmem:[%s1260_s2 + $0x50] sm:$0xff] }
   0x8   :  { %948 = vmatprep.mubr.msk.bf16.mxu0 %vm135_vm0, %v986_v13  ;;  %964 = vmatprep.mubr.msk.bf16.mxu1 %vm135_vm0, %v987_v14  ;;  %v991_v21 = vld [vmem:[%s1262_s0 + $0x60] sm:$0xff]   ;;  %v356_v22 = vld [vmem:[%s1260_s2 + $0x58] sm:$0xff]  ;;  %v992_v24 = vld [vmem:[%s1262_s0 + $0x28] sm:$0xff]  }
   0x9   :  { %v993_v25 = vld [vmem:[%s1262_s0 + $0x68] sm:$0xff]   ;;  %v994_v26 = vld [vmem:[%s1262_s0 + $0x30] sm:$0xff]   ;;  %v357_v28 = vld [vmem:[%s1260_s2 + $0x60] sm:$0xff] }
   0xa   :  { %404 = vperm.xlu1 %980, %v350_v10   ;;  %399 = vperm.xlu0 %979, %v349_v11   ;;  %v358_v27 = vld [vmem:[%s1260_s2 + $0x68] sm:$0xff]  ;;  %v995_v29 = vld [vmem:[%s1262_s0 + $0x70] sm:$0xff]   ;;  %v360_v30 = vld [vmem:[%s1260_s2 + $0x78] sm:$0xff] }
   0xb   :  { %v359_v31 = vld [vmem:[%s1260_s2 + $0x70] sm:$0xff]  ;;  %v996_v32 = vld [vmem:[%s1262_s0 + $0x38] sm:$0xff]   ;;  %v362_v34 = vld [vmem:[%s1260_s2 + $0x88] sm:$0xff] }
   0xc   :  { %v997_v33 = vld [vmem:[%s1262_s0 + $0x78] sm:$0xff]   ;;  %v361_v35 = vld [vmem:[%s1260_s2 + $0x80] sm:$0xff]  ;;  %v363_v37 = vld [vmem:[%s1260_s2 + $0x90] sm:$0xff] }
   0xd   :  { %v364_v36 = vld [vmem:[%s1260_s2 + $0x98] sm:$0xff]  ;;  %v366_v38 = vld [vmem:[%s1260_s2 + $0xa8] sm:$0xff]  ;;  %v365_v39 = vld [vmem:[%s1260_s2 + $0xa0] sm:$0xff] }
   0xe   :  { %414 = vperm.xlu1 %980, %v352_v12   ;;  %409 = vperm.xlu0 %979, %v351_v15   ;;  %v368_v40 = vld [vmem:[%s1260_s2 + $0xb8] sm:$0xff]  ;;  %v367_v41 = vld [vmem:[%s1260_s2 + $0xb0] sm:$0xff]  ;;  %v370_v42 = vld [vmem:[%s1260_s2 + $0xc8] sm:$0xff] }
   0xf   :  { %949 = vmatmul.mubr.msk.bf16.gmra.mrb[4].mxu0 %vm135_vm0, %v988_v16  ;;  %965 = vmatmul.mubr.msk.bf16.gmra.mrb[4].mxu1 %vm135_vm0, %v989_v17  ;;  %v369_v43 = vld [vmem:[%s1260_s2 + $0xc0] sm:$0xff]  ;;  %v372_v44 = vld [vmem:[%s1260_s2 + $0xd8] sm:$0xff]  ;;  %v371_v45 = vld [vmem:[%s1260_s2 + $0xd0] sm:$0xff] }
  0x10   :  { %952 = vmatprep.mubr.msk.bf16.mxu0 %vm135_vm0, %v990_v20  ;;  %968 = vmatprep.mubr.msk.bf16.mxu1 %vm135_vm0, %v991_v21  ;;  %v374_v46 = vld [vmem:[%s1260_s2 + $0xe8] sm:$0xff]  ;;  %v373_v47 = vld [vmem:[%s1260_s2 + $0xe0] sm:$0xff]  ;;  %v376_v48 = vld [vmem:[%s1260_s2 + $0xf8] sm:$0xff] }
  0x11   :  { %v375_v49 = vld [vmem:[%s1260_s2 + $0xf0] sm:$0xff] }
  0x12   :  { %424 = vperm.xlu1 %980, %v354_v18   ;;  %419 = vperm.xlu0 %979, %v353_v19  }
  0x16   :  { %434 = vperm.xlu1 %980, %v356_v22   ;;  %429 = vperm.xlu0 %979, %v355_v23  }
  0x17   :  { %953 = vmatmul.mubr.msk.bf16.gmra.mrb[8].mxu0 %vm135_vm0, %v992_v24  ;;  %969 = vmatmul.mubr.msk.bf16.gmra.mrb[8].mxu1 %vm135_vm0, %v993_v25 }
  0x18   :  { %956 = vmatprep.mubr.msk.bf16.mxu0 %vm135_vm0, %v994_v26  ;;  %972 = vmatprep.mubr.msk.bf16.mxu1 %vm135_vm0, %v995_v29 }
  0x1a   :  { %444 = vperm.xlu1 %980, %v358_v27   ;;  %439 = vperm.xlu0 %979, %v357_v28  }
  0x1e   :  { %454 = vperm.xlu1 %980, %v360_v30   ;;  %449 = vperm.xlu0 %979, %v359_v31  }
  0x1f   :  { %957 = vmatmul.mubr.msk.bf16.gmra.mrb[12].mxu0 %vm135_vm0, %v996_v32  ;;  %973 = vmatmul.mubr.msk.bf16.gmra.mrb[12].mxu1 %vm135_vm0, %v997_v33 }
  0x22   :  { %464 = vperm.xlu1 %980, %v362_v34   ;;  %459 = vperm.xlu0 %979, %v361_v35  }
  0x26   :  { %474 = vperm.xlu1 %980, %v364_v36   ;;  %469 = vperm.xlu0 %979, %v363_v37  }
  0x2a   :  { %484 = vperm.xlu1 %980, %v366_v38   ;;  %479 = vperm.xlu0 %979, %v365_v39  }
  0x2e   :  { %494 = vperm.xlu1 %980, %v368_v40   ;;  %489 = vperm.xlu0 %979, %v367_v41  }
  0x32   :  { %504 = vperm.xlu1 %980, %v370_v42   ;;  %499 = vperm.xlu0 %979, %v369_v43  }
  0x36   :  { %514 = vperm.xlu1 %980, %v372_v44   ;;  %509 = vperm.xlu0 %979, %v371_v45  }
  0x3a   :  { %524 = vperm.xlu1 %980, %v374_v46   ;;  %519 = vperm.xlu0 %979, %v373_v47  }
  0x3e   :  { %534 = vperm.xlu1 %980, %v376_v48   ;;  %529 = vperm.xlu0 %979, %v375_v49  }
  0x81   :  { %v390_v50 = vpop.permute.xlu1 %389  ;;  %v380_v51 = vpop.permute.xlu0 %379 }
  0x85   :  { %v395_v52 = vpop.permute.xlu1 %394  ;;  %v385_v53 = vpop.permute.xlu0 %384 }
  0x89   :  { %v405_v54 = vpop.permute.xlu1 %404  ;;  %v400_v55 = vpop.permute.xlu0 %399 }
  0x8d   :  { %v415_v56 = vpop.permute.xlu1 %414  ;;  %v410_v57 = vpop.permute.xlu0 %409 }
  0x91   :  { %v1182_v58 = vpop.permute.xlu1 %424  ;;  %v1184_v59 = vpop.permute.xlu0 %419 }
  0x95   :  { %v1186_v60 = vpop.permute.xlu1 %434  ;;  %v1188_v61 = vpop.permute.xlu0 %429 }
  0x99   :  { %v1190_v62 = vpop.permute.xlu1 %444  ;;  %v1192_v63 = vpop.permute.xlu0 %439 }
  0x9d   :  { %v1194_v0 = vpop.permute.xlu1 %454  ;;  %v1196_v1 = vpop.permute.xlu0 %449 }
  0xa1   :  { %v465_v2 = vpop.permute.xlu1 %464  ;;  %v460_v3 = vpop.permute.xlu0 %459 }
  0xa5   :  { %v475_v4 = vpop.permute.xlu1 %474  ;;  %v470_v5 = vpop.permute.xlu0 %469 }
  0xa9   :  { %v485_v6 = vpop.permute.xlu1 %484  ;;  %v480_v7 = vpop.permute.xlu0 %479 }
  0xad   :  { %v495_v8 = vpop.permute.xlu1 %494  ;;  %v490_v9 = vpop.permute.xlu0 %489 }
  0xb1   :  { %v1198_v10 = vpop.permute.xlu1 %504  ;;  %v1200_v11 = vpop.permute.xlu0 %499 }
  0xb5   :  { %v515_v31 = vpop.permute.xlu1 %514  ;;  %v510_v33 = vpop.permute.xlu0 %509 }
  0xda   :  { %v946_v12 = vpop.f32.mrb[0].mxu0  ;;  %v962_v13 = vpop.f32.mrb[0].mxu1 }
  0xdb   :  { %v218_v14 = vpop.f32.mrb[1].mxu0  ;;  %v282_v15 = vpop.f32.mrb[1].mxu1  ;;  %v539_v17 = vmul.f32 %v946_v12, %v390_v50  ;;  %v555_v21 = vmul.f32 %v962_v13, %v470_v5 }
  0xdc   :  { %v947_v16 = vpop.f32.mrb[2].mxu0  ;;  %v963_v19 = vpop.f32.mrb[2].mxu1  ;;  %v537_v22 = vmul.f32 %v380_v51, %v218_v14  ;;  %v553_v26 = vmul.f32 %v460_v3, %v282_v15 }
  0xdd   :  { %v540_v18 = vmul.f32 %v947_v16, %v395_v52  ;;  %v221_v20 = vpop.f32.mrb[3].mxu0  ;;  %v556_v23 = vmul.f32 %v963_v19, %v475_v4  ;;  %v285_v25 = vpop.f32.mrb[3].mxu1 }
  0xde   :  { %v538_v24 = vmul.f32 %v385_v53, %v221_v20  ;;  %v554_v28 = vmul.f32 %v465_v2, %v285_v25  ;;  %v525_v53 = vpop.permute.xlu1 %524 }
  0xdf   :  { %v838_v27 = vpack.c.bf16 %v540_v18, %v539_v17  ;;  %v878_v29 = vpack.c.bf16 %v556_v23, %v555_v21 }
  0xe0   :  { %v833_v30 = vpack.c.bf16 %v538_v24, %v537_v22  ;;  %v873_v32 = vpack.c.bf16 %v554_v28, %v553_v26 }
  0xe1   :  { %910 = vst [vmem:[%s1263_s3 + $0x8] sm:$0xff] %v838_v27   ;;  %918 = vst [vmem:[%s1263_s3 + $0x48] sm:$0xff] %v878_v29  }
  0xe2   :  { %834 = vst [vmem:[%s1263_s3] sm:$0xff] %v833_v30   ;;  %v950_v34 = vpop.f32.mrb[4].mxu0  ;;  %917 = vst [vmem:[%s1263_s3 + $0x40] sm:$0xff] %v873_v32   ;;  %v966_v35 = vpop.f32.mrb[4].mxu1 }
  0xe3   :  { %v234_v36 = vpop.f32.mrb[5].mxu0  ;;  %v298_v37 = vpop.f32.mrb[5].mxu1  ;;  %v543_v39 = vmul.f32 %v950_v34, %v410_v57  ;;  %v559_v43 = vmul.f32 %v966_v35, %v490_v9 }
  0xe4   :  { %v951_v38 = vpop.f32.mrb[6].mxu0  ;;  %v967_v41 = vpop.f32.mrb[6].mxu1  ;;  %v541_v44 = vmul.f32 %v400_v55, %v234_v36  ;;  %v557_v48 = vmul.f32 %v480_v7, %v298_v37 }
  0xe5   :  { %v544_v40 = vmul.f32 %v951_v38, %v415_v56  ;;  %v237_v42 = vpop.f32.mrb[7].mxu0  ;;  %v560_v45 = vmul.f32 %v967_v41, %v495_v8  ;;  %v301_v47 = vpop.f32.mrb[7].mxu1 }
  0xe6   :  { %v542_v46 = vmul.f32 %v405_v54, %v237_v42  ;;  %v558_v50 = vmul.f32 %v485_v6, %v301_v47  ;;  %v520_v57 = vpop.permute.xlu0 %519  ;;  %v535_v21 = vpop.permute.xlu1 %534 }
  0xe7   :  { %v848_v49 = vpack.c.bf16 %v544_v40, %v543_v39  ;;  %v888_v51 = vpack.c.bf16 %v560_v45, %v559_v43 }
  0xe8   :  { %v843_v52 = vpack.c.bf16 %v542_v46, %v541_v44  ;;  %v883_v2 = vpack.c.bf16 %v558_v50, %v557_v48 }
  0xe9   :  { %912 = vst [vmem:[%s1263_s3 + $0x18] sm:$0xff] %v848_v49   ;;  %920 = vst [vmem:[%s1263_s3 + $0x58] sm:$0xff] %v888_v51  }
  0xea   :  { %911 = vst [vmem:[%s1263_s3 + $0x10] sm:$0xff] %v843_v52   ;;  %v954_v54 = vpop.f32.mrb[8].mxu0  ;;  %919 = vst [vmem:[%s1263_s3 + $0x50] sm:$0xff] %v883_v2   ;;  %v970_v55 = vpop.f32.mrb[8].mxu1 }
  0xeb   :  { %v250_v56 = vpop.f32.mrb[9].mxu0  ;;  %v314_v3 = vpop.f32.mrb[9].mxu1  ;;  %v547_v5 = vmul.f32 %v954_v54, %v1188_v61  ;;  %v563_v9 = vmul.f32 %v970_v55, %v510_v33 }
  0xec   :  { %v955_v4 = vpop.f32.mrb[10].mxu0  ;;  %v971_v7 = vpop.f32.mrb[10].mxu1  ;;  %v545_v12 = vmul.f32 %v1184_v59, %v250_v56  ;;  %v561_v16 = vmul.f32 %v1200_v11, %v314_v3 }
  0xed   :  { %v548_v6 = vmul.f32 %v955_v4, %v1186_v60  ;;  %v253_v8 = vpop.f32.mrb[11].mxu0  ;;  %v564_v13 = vmul.f32 %v971_v7, %v515_v31  ;;  %v317_v15 = vpop.f32.mrb[11].mxu1 }
  0xee   :  { %v546_v14 = vmul.f32 %v1182_v58, %v253_v8  ;;  %v562_v18 = vmul.f32 %v1198_v10, %v317_v15  ;;  %v530_v61 = vpop.permute.xlu0 %529 }
  0xef   :  { %v858_v17 = vpack.c.bf16 %v548_v6, %v547_v5  ;;  %v898_v19 = vpack.c.bf16 %v564_v13, %v563_v9 }
  0xf0   :  { %v853_v20 = vpack.c.bf16 %v546_v14, %v545_v12  ;;  %v893_v60 = vpack.c.bf16 %v562_v18, %v561_v16 }
  0xf1   :  { %914 = vst [vmem:[%s1263_s3 + $0x28] sm:$0xff] %v858_v17   ;;  %922 = vst [vmem:[%s1263_s3 + $0x68] sm:$0xff] %v898_v19  }
  0xf2   :  { %913 = vst [vmem:[%s1263_s3 + $0x20] sm:$0xff] %v853_v20   ;;  %v958_v58 = vpop.f32.mrb[12].mxu0  ;;  %921 = vst [vmem:[%s1263_s3 + $0x60] sm:$0xff] %v893_v60   ;;  %v974_v59 = vpop.f32.mrb[12].mxu1 }
  0xf3   :  { %v266_v10 = vpop.f32.mrb[13].mxu0  ;;  %v330_v11 = vpop.f32.mrb[13].mxu1  ;;  %v551_v23 = vmul.f32 %v958_v58, %v1196_v1  ;;  %v567_v27 = vmul.f32 %v974_v59, %v530_v61 }
  0xf4   :  { %v959_v22 = vpop.f32.mrb[14].mxu0  ;;  %v975_v25 = vpop.f32.mrb[14].mxu1  ;;  %v549_v28 = vmul.f32 %v1192_v63, %v266_v10  ;;  %v565_v32 = vmul.f32 %v520_v57, %v330_v11 }
  0xf5   :  { %v552_v24 = vmul.f32 %v959_v22, %v1194_v0  ;;  %v269_v26 = vpop.f32.mrb[15].mxu0  ;;  %v568_v29 = vmul.f32 %v975_v25, %v535_v21  ;;  %v333_v31 = vpop.f32.mrb[15].mxu1 }
  0xf6   :  { %v550_v30 = vmul.f32 %v1190_v62, %v269_v26  ;;  %v566_v34 = vmul.f32 %v525_v53, %v333_v31 }
  0xf7   :  { %v868_v33 = vpack.c.bf16 %v552_v24, %v551_v23  ;;  %v908_v35 = vpack.c.bf16 %v568_v29, %v567_v27 }
  0xf8   :  { %v863_v36 = vpack.c.bf16 %v550_v30, %v549_v28  ;;  %v903_v1 = vpack.c.bf16 %v566_v34, %v565_v32 }
  0xf9   :  { %916 = vst [vmem:[%s1263_s3 + $0x38] sm:$0xff] %v868_v33   ;;  %924 = vst [vmem:[%s1263_s3 + $0x78] sm:$0xff] %v908_v35  }
  0xfa   :  { %915 = vst [vmem:[%s1263_s3 + $0x30] sm:$0xff] %v863_v36   ;;  %923 = vst [vmem:[%s1263_s3 + $0x70] sm:$0xff] %v903_v1  }

// kernel: gcn_wrapper_forward.6
= control target key start
LH: loop header
LB: loop body
LE: loop exit
PB: predicated region body
PF: predicated region fallthrough
CT: control target
= control target key end

     0   :  { %v1054_v1 = vmov 0   ;;  %s1324_s1 = inlined_call_operand.vmem [shape: bf16[128,128], index: 1, kind: input, shape index: {}]   ;;  %s1325_s2 = inlined_call_operand.vmem [shape: f32[256,1], index: 2, kind: input, shape index: {}]   ;;  %s1326_s0 = inlined_call_operand.vmem [shape: bf16[256,128], index: 0, kind: input, shape index: {}]   ;;  %s1327_s3 = inlined_call_operand.vmem [shape: bf16[256,128], index: 3, kind: output, shape index: {}]  }
   0x1   :  { %v1030_v0 = vld [vmem:[%s1324_s1] sm:$0xff]   ;;  %1029 = vset.pattern.permute.xlu1 %v1054_v1  ;;  %1028 = vset.pattern.permute.xlu0 %v1054_v1  ;;  %v1031_v2 = vld [vmem:[%s1324_s1 + $0x8] sm:$0xff]   ;;  %v1032_v3 = vld [vmem:[%s1324_s1 + $0x10] sm:$0xff]  }
   0x2   :  { %963 = vmatprep.subr.bf16.mxu0 %v1030_v0  ;;  %1011 = vmatprep.subr.bf16.mxu1 %v1030_v0  ;;  %v370_v4 = vld [vmem:[%s1325_s2 + $0x10] sm:$0xff]  ;;  %v368_v5 = vld [vmem:[%s1325_s2] sm:$0xff]  ;;  %v1033_v6 = vld [vmem:[%s1324_s1 + $0x18] sm:$0xff]  }
   0x3   :  { %964 = vmatpush3.bf16.msra.mxu0 %v1030_v0  ;;  %1019 = vmatpush3.bf16.msra.mxu1 %v1030_v0  ;;  %v371_v7 = vld [vmem:[%s1325_s2 + $0x18] sm:$0xff]  ;;  %v369_v8 = vld [vmem:[%s1325_s2 + $0x8] sm:$0xff]  ;;  %v1038_v9 = vld [vmem:[%s1326_s0] sm:$0xff]  }
   0x4   :  { %965 = vmatprep.subr.bf16.mxu0 %v1031_v2  ;;  %1012 = vmatprep.subr.bf16.mxu1 %v1031_v2  ;;  %v1039_v10 = vld [vmem:[%s1326_s0 + $0x40] sm:$0xff]   ;;  %v373_v12 = vld [vmem:[%s1325_s2 + $0x28] sm:$0xff]  ;;  %v375_v15 = vld [vmem:[%s1325_s2 + $0x38] sm:$0xff] }
   0x5   :  { %412 = vperm.xlu1 %1029, %v370_v4   ;;  %402 = vperm.xlu0 %1028, %v368_v5   ;;  %v1034_v11 = vld [vmem:[%s1324_s1 + $0x20] sm:$0xff]   ;;  %v1035_v14 = vld [vmem:[%s1324_s1 + $0x28] sm:$0xff]   ;;  %v374_v16 = vld [vmem:[%s1325_s2 + $0x30] sm:$0xff] }
   0x6   :  { %v372_v13 = vld [vmem:[%s1325_s2 + $0x20] sm:$0xff]  ;;  %979 = vmatprep.mubr.bf16.mxu0 %v1038_v9  ;;  %995 = vmatprep.mubr.bf16.mxu1 %v1039_v10  ;;  %v1036_v17 = vld [vmem:[%s1324_s1 + $0x30] sm:$0xff]   ;;  %v377_v18 = vld [vmem:[%s1325_s2 + $0x48] sm:$0xff] }
   0x7   :  { %966 = vmatpush3.bf16.msra.mxu0 %v1031_v2  ;;  %1020 = vmatpush3.bf16.msra.mxu1 %v1031_v2  ;;  %v376_v19 = vld [vmem:[%s1325_s2 + $0x40] sm:$0xff]  ;;  %v1037_v20 = vld [vmem:[%s1324_s1 + $0x38] sm:$0xff]   ;;  %v378_v22 = vld [vmem:[%s1325_s2 + $0x50] sm:$0xff] }
   0x8   :  { %967 = vmatprep.subr.bf16.mxu0 %v1032_v3  ;;  %1013 = vmatprep.subr.bf16.mxu1 %v1032_v3  ;;  %v379_v21 = vld [vmem:[%s1325_s2 + $0x58] sm:$0xff]  ;;  %v1040_v23 = vld [vmem:[%s1326_s0 + $0x8] sm:$0xff]   ;;  %v380_v26 = vld [vmem:[%s1325_s2 + $0x60] sm:$0xff] }
   0x9   :  { %417 = vperm.xlu1 %1029, %v371_v7   ;;  %407 = vperm.xlu0 %1028, %v369_v8   ;;  %v1041_v24 = vld [vmem:[%s1326_s0 + $0x48] sm:$0xff]   ;;  %v1042_v27 = vld [vmem:[%s1326_s0 + $0x10] sm:$0xff]   ;;  %v383_v29 = vld [vmem:[%s1325_s2 + $0x78] sm:$0xff] }
   0xa   :  { %v381_v25 = vld [vmem:[%s1325_s2 + $0x68] sm:$0xff]  ;;  %v1043_v28 = vld [vmem:[%s1326_s0 + $0x50] sm:$0xff]   ;;  %v1044_v31 = vld [vmem:[%s1326_s0 + $0x18] sm:$0xff]  }
   0xb   :  { %968 = vmatpush3.bf16.msra.mxu0 %v1032_v3  ;;  %1021 = vmatpush3.bf16.msra.mxu1 %v1032_v3  ;;  %v382_v30 = vld [vmem:[%s1325_s2 + $0x70] sm:$0xff]  ;;  %v1045_v32 = vld [vmem:[%s1326_s0 + $0x58] sm:$0xff]   ;;  %v385_v33 = vld [vmem:[%s1325_s2 + $0x88] sm:$0xff] }
   0xc   :  { %969 = vmatprep.subr.bf16.mxu0 %v1033_v6  ;;  %1014 = vmatprep.subr.bf16.mxu1 %v1033_v6  ;;  %v384_v34 = vld [vmem:[%s1325_s2 + $0x80] sm:$0xff]  ;;  %v387_v37 = vld [vmem:[%s1325_s2 + $0x98] sm:$0xff]  ;;  %v386_v38 = vld [vmem:[%s1325_s2 + $0x90] sm:$0xff] }
   0xd   :  { %427 = vperm.xlu1 %1029, %v373_v12   ;;  %422 = vperm.xlu0 %1028, %v372_v13   ;;  %v1046_v35 = vld [vmem:[%s1326_s0 + $0x20] sm:$0xff]   ;;  %v1048_v39 = vld [vmem:[%s1326_s0 + $0x28] sm:$0xff]   ;;  %v1050_v43 = vld [vmem:[%s1326_s0 + $0x30] sm:$0xff]  }
   0xe   :  { %v1047_v36 = vld [vmem:[%s1326_s0 + $0x60] sm:$0xff]   ;;  %v1049_v40 = vld [vmem:[%s1326_s0 + $0x68] sm:$0xff]   ;;  %v1051_v44 = vld [vmem:[%s1326_s0 + $0x70] sm:$0xff]  }
   0xf   :  { %970 = vmatpush3.bf16.msra.mxu0 %v1033_v6  ;;  %1022 = vmatpush3.bf16.msra.mxu1 %v1033_v6  ;;  %v389_v41 = vld [vmem:[%s1325_s2 + $0xa8] sm:$0xff]  ;;  %v388_v42 = vld [vmem:[%s1325_s2 + $0xa0] sm:$0xff]  ;;  %v391_v45 = vld [vmem:[%s1325_s2 + $0xb8] sm:$0xff] }
  0x10   :  { %971 = vmatprep.subr.bf16.mxu0 %v1034_v11  ;;  %1015 = vmatprep.subr.bf16.mxu1 %v1034_v11  ;;  %v390_v46 = vld [vmem:[%s1325_s2 + $0xb0] sm:$0xff]  ;;  %v1052_v47 = vld [vmem:[%s1326_s0 + $0x38] sm:$0xff]   ;;  %v393_v49 = vld [vmem:[%s1325_s2 + $0xc8] sm:$0xff] }
  0x11   :  { %437 = vperm.xlu1 %1029, %v375_v15   ;;  %432 = vperm.xlu0 %1028, %v374_v16   ;;  %v1053_v48 = vld [vmem:[%s1326_s0 + $0x78] sm:$0xff]   ;;  %v392_v50 = vld [vmem:[%s1325_s2 + $0xc0] sm:$0xff]  ;;  %v394_v52 = vld [vmem:[%s1325_s2 + $0xd0] sm:$0xff] }
  0x12   :  { %v395_v51 = vld [vmem:[%s1325_s2 + $0xd8] sm:$0xff]  ;;  %v397_v53 = vld [vmem:[%s1325_s2 + $0xe8] sm:$0xff]  ;;  %v396_v54 = vld [vmem:[%s1325_s2 + $0xe0] sm:$0xff] }
  0x13   :  { %972 = vmatpush3.bf16.msra.mxu0 %v1034_v11  ;;  %1023 = vmatpush3.bf16.msra.mxu1 %v1034_v11  ;;  %v399_v55 = vld [vmem:[%s1325_s2 + $0xf8] sm:$0xff]  ;;  %v398_v56 = vld [vmem:[%s1325_s2 + $0xf0] sm:$0xff] }
  0x14   :  { %973 = vmatprep.subr.bf16.mxu0 %v1035_v14  ;;  %1016 = vmatprep.subr.bf16.mxu1 %v1035_v14 }
  0x15   :  { %447 = vperm.xlu1 %1029, %v377_v18   ;;  %442 = vperm.xlu0 %1028, %v376_v19  }
  0x17   :  { %974 = vmatpush3.bf16.msra.mxu0 %v1035_v14  ;;  %1024 = vmatpush3.bf16.msra.mxu1 %v1035_v14 }
  0x18   :  { %975 = vmatprep.subr.bf16.mxu0 %v1036_v17  ;;  %1017 = vmatprep.subr.bf16.mxu1 %v1036_v17 }
  0x19   :  { %457 = vperm.xlu1 %1029, %v379_v21   ;;  %452 = vperm.xlu0 %1028, %v378_v22  }
  0x1b   :  { %976 = vmatpush3.bf16.msra.mxu0 %v1036_v17  ;;  %1025 = vmatpush3.bf16.msra.mxu1 %v1036_v17 }
  0x1c   :  { %977 = vmatprep.subr.bf16.mxu0 %v1037_v20  ;;  %1018 = vmatprep.subr.bf16.mxu1 %v1037_v20 }
  0x1d   :  { %467 = vperm.xlu1 %1029, %v381_v25   ;;  %462 = vperm.xlu0 %1028, %v380_v26  }
  0x1f   :  { %978 = vmatpush3.bf16.msra.mxu0 %v1037_v20  ;;  %1026 = vmatpush3.bf16.msra.mxu1 %v1037_v20 }
  0x21   :  { %477 = vperm.xlu1 %1029, %v383_v29   ;;  %472 = vperm.xlu0 %1028, %v382_v30  }
  0x22   :  { %980 = vmatmul.mubr.bf16.vlgmr.msra.gmra.mrb[0].mxu0 %v1040_v23  ;;  %996 = vmatmul.mubr.bf16.vlgmr.msra.gmra.mrb[0].mxu1 %v1041_v24 }
  0x23   :  { %983 = vmatprep.mubr.bf16.mxu0 %v1042_v27  ;;  %999 = vmatprep.mubr.bf16.mxu1 %v1043_v28 }
  0x25   :  { %487 = vperm.xlu1 %1029, %v385_v33   ;;  %482 = vperm.xlu0 %1028, %v384_v34  }
  0x29   :  { %497 = vperm.xlu1 %1029, %v387_v37   ;;  %492 = vperm.xlu0 %1028, %v386_v38  }
  0x2a   :  { %984 = vmatmul.mubr.bf16.gmra.mrb[4].mxu0 %v1044_v31  ;;  %1000 = vmatmul.mubr.bf16.gmra.mrb[4].mxu1 %v1045_v32 }
  0x2b   :  { %987 = vmatprep.mubr.bf16.mxu0 %v1046_v35  ;;  %1003 = vmatprep.mubr.bf16.mxu1 %v1047_v36 }
  0x2d   :  { %507 = vperm.xlu1 %1029, %v389_v41   ;;  %502 = vperm.xlu0 %1028, %v388_v42  }
  0x31   :  { %517 = vperm.xlu1 %1029, %v391_v45   ;;  %512 = vperm.xlu0 %1028, %v390_v46  }
  0x32   :  { %988 = vmatmul.mubr.bf16.gmra.mrb[8].mxu0 %v1048_v39  ;;  %1004 = vmatmul.mubr.bf16.gmra.mrb[8].mxu1 %v1049_v40 }
  0x33   :  { %991 = vmatprep.mubr.bf16.mxu0 %v1050_v43  ;;  %1007 = vmatprep.mubr.bf16.mxu1 %v1051_v44 }
  0x35   :  { %527 = vperm.xlu1 %1029, %v393_v49   ;;  %522 = vperm.xlu0 %1028, %v392_v50  }
  0x39   :  { %537 = vperm.xlu1 %1029, %v395_v51   ;;  %532 = vperm.xlu0 %1028, %v394_v52  }
  0x3a   :  { %992 = vmatmul.mubr.bf16.gmra.mrb[12].mxu0 %v1052_v47  ;;  %1008 = vmatmul.mubr.bf16.gmra.mrb[12].mxu1 %v1053_v48 }
  0x3d   :  { %547 = vperm.xlu1 %1029, %v397_v53   ;;  %542 = vperm.xlu0 %1028, %v396_v54  }
  0x41   :  { %557 = vperm.xlu1 %1029, %v399_v55   ;;  %552 = vperm.xlu0 %1028, %v398_v56  }
  0x84   :  { %v413_v57 = vpop.permute.xlu1 %412  ;;  %v403_v58 = vpop.permute.xlu0 %402 }
  0x88   :  { %v418_v59 = vpop.permute.xlu1 %417  ;;  %v408_v60 = vpop.permute.xlu0 %407 }
  0x8c   :  { %v1243_v61 = vpop.permute.xlu1 %427  ;;  %v423_v62 = vpop.permute.xlu0 %422 }
  0x90   :  { %v438_v63 = vpop.permute.xlu1 %437  ;;  %v433_v0 = vpop.permute.xlu0 %432 }
  0x94   :  { %v1245_v1 = vpop.permute.xlu1 %447  ;;  %v1247_v2 = vpop.permute.xlu0 %442 }
  0x98   :  { %v1249_v3 = vpop.permute.xlu1 %457  ;;  %v1251_v4 = vpop.permute.xlu0 %452 }
  0x9c   :  { %v1253_v5 = vpop.permute.xlu1 %467  ;;  %v1255_v6 = vpop.permute.xlu0 %462 }
  0xa0   :  { %v1257_v7 = vpop.permute.xlu1 %477  ;;  %v1259_v8 = vpop.permute.xlu0 %472 }
  0xa4   :  { %v488_v9 = vpop.permute.xlu1 %487  ;;  %v483_v10 = vpop.permute.xlu0 %482 }
  0xa8   :  { %v498_v11 = vpop.permute.xlu1 %497  ;;  %v493_v12 = vpop.permute.xlu0 %492 }
  0xac   :  { %v508_v13 = vpop.permute.xlu1 %507  ;;  %v503_v14 = vpop.permute.xlu0 %502 }
  0xb0   :  { %v518_v15 = vpop.permute.xlu1 %517  ;;  %v513_v16 = vpop.permute.xlu0 %512 }
  0xb4   :  { %v1261_v17 = vpop.permute.xlu1 %527  ;;  %v1263_v18 = vpop.permute.xlu0 %522 }
  0xb8   :  { %v538_v39 = vpop.permute.xlu1 %537  ;;  %v533_v40 = vpop.permute.xlu0 %532 }
  0xf5   :  { %v981_v19 = vpop.f32.mrb[0].mxu0  ;;  %v997_v20 = vpop.f32.mrb[0].mxu1 }
  0xf6   :  { %v241_v21 = vpop.f32.mrb[1].mxu0  ;;  %v305_v22 = vpop.f32.mrb[1].mxu1  ;;  %v562_v25 = vmul.f32 %v981_v19, %v413_v57  ;;  %v578_v26 = vmul.f32 %v997_v20, %v493_v12 }
  0xf7   :  { %v982_v23 = vpop.f32.mrb[2].mxu0  ;;  %v998_v24 = vpop.f32.mrb[2].mxu1  ;;  %v560_v31 = vmul.f32 %v403_v58, %v241_v21  ;;  %v576_v32 = vmul.f32 %v483_v10, %v305_v22 }
  0xf8   :  { %v563_v27 = vmul.f32 %v982_v23, %v418_v59  ;;  %v579_v28 = vmul.f32 %v998_v24, %v498_v11  ;;  %v244_v29 = vpop.f32.mrb[3].mxu0  ;;  %v308_v30 = vpop.f32.mrb[3].mxu1 }
  0xf9   :  { %v561_v33 = vmul.f32 %v408_v60, %v244_v29  ;;  %v577_v34 = vmul.f32 %v488_v9, %v308_v30  ;;  %v548_v9 = vpop.permute.xlu1 %547  ;;  %v543_v10 = vpop.permute.xlu0 %542 }
  0xfa   :  { %v852_v35 = vpack.c.bf16 %v563_v27, %v562_v25  ;;  %v892_v36 = vpack.c.bf16 %v579_v28, %v578_v26 }
  0xfb   :  { %v847_v37 = vpack.c.bf16 %v561_v33, %v560_v31  ;;  %v887_v38 = vpack.c.bf16 %v577_v34, %v576_v32 }
  0xfc   :  { %924 = vst [vmem:[%s1327_s3 + $0x8] sm:$0xff] %v852_v35   ;;  %932 = vst [vmem:[%s1327_s3 + $0x48] sm:$0xff] %v892_v36  }
  0xfd   :  { %848 = vst [vmem:[%s1327_s3] sm:$0xff] %v847_v37   ;;  %931 = vst [vmem:[%s1327_s3 + $0x40] sm:$0xff] %v887_v38   ;;  %v985_v41 = vpop.f32.mrb[4].mxu0  ;;  %v1001_v42 = vpop.f32.mrb[4].mxu1 }
  0xfe   :  { %v257_v43 = vpop.f32.mrb[5].mxu0  ;;  %v321_v44 = vpop.f32.mrb[5].mxu1  ;;  %v566_v47 = vmul.f32 %v985_v41, %v433_v0  ;;  %v582_v48 = vmul.f32 %v1001_v42, %v513_v16 }
  0xff   :  { %v986_v45 = vpop.f32.mrb[6].mxu0  ;;  %v1002_v46 = vpop.f32.mrb[6].mxu1  ;;  %v564_v53 = vmul.f32 %v423_v62, %v257_v43  ;;  %v580_v54 = vmul.f32 %v503_v14, %v321_v44 }
 0x100   :  { %v567_v49 = vmul.f32 %v986_v45, %v438_v63  ;;  %v583_v50 = vmul.f32 %v1002_v46, %v518_v15  ;;  %v260_v51 = vpop.f32.mrb[7].mxu0  ;;  %v324_v52 = vpop.f32.mrb[7].mxu1 }
 0x101   :  { %v565_v55 = vmul.f32 %v1243_v61, %v260_v51  ;;  %v581_v56 = vmul.f32 %v508_v13, %v324_v52  ;;  %v558_v29 = vpop.permute.xlu1 %557 }
 0x102   :  { %v862_v57 = vpack.c.bf16 %v567_v49, %v566_v47  ;;  %v902_v58 = vpack.c.bf16 %v583_v50, %v582_v48 }
 0x103   :  { %v857_v59 = vpack.c.bf16 %v565_v55, %v564_v53  ;;  %v897_v60 = vpack.c.bf16 %v581_v56, %v580_v54 }
 0x104   :  { %926 = vst [vmem:[%s1327_s3 + $0x18] sm:$0xff] %v862_v57   ;;  %934 = vst [vmem:[%s1327_s3 + $0x58] sm:$0xff] %v902_v58  }
 0x105   :  { %925 = vst [vmem:[%s1327_s3 + $0x10] sm:$0xff] %v857_v59   ;;  %933 = vst [vmem:[%s1327_s3 + $0x50] sm:$0xff] %v897_v60   ;;  %v989_v61 = vpop.f32.mrb[8].mxu0  ;;  %v1005_v62 = vpop.f32.mrb[8].mxu1 }
 0x106   :  { %v273_v63 = vpop.f32.mrb[9].mxu0  ;;  %v337_v0 = vpop.f32.mrb[9].mxu1  ;;  %v570_v13 = vmul.f32 %v989_v61, %v1251_v4  ;;  %v586_v14 = vmul.f32 %v1005_v62, %v533_v40 }
 0x107   :  { %v990_v11 = vpop.f32.mrb[10].mxu0  ;;  %v1006_v12 = vpop.f32.mrb[10].mxu1  ;;  %v568_v21 = vmul.f32 %v1247_v2, %v273_v63  ;;  %v584_v22 = vmul.f32 %v1263_v18, %v337_v0 }
 0x108   :  { %v571_v15 = vmul.f32 %v990_v11, %v1249_v3  ;;  %v587_v16 = vmul.f32 %v1006_v12, %v538_v39  ;;  %v276_v19 = vpop.f32.mrb[11].mxu0  ;;  %v340_v20 = vpop.f32.mrb[11].mxu1 }
 0x109   :  { %v569_v23 = vmul.f32 %v1245_v1, %v276_v19  ;;  %v585_v24 = vmul.f32 %v1261_v17, %v340_v20  ;;  %v553_v4 = vpop.permute.xlu0 %552 }
 0x10a   :  { %v872_v25 = vpack.c.bf16 %v571_v15, %v570_v13  ;;  %v912_v26 = vpack.c.bf16 %v587_v16, %v586_v14 }
 0x10b   :  { %v867_v27 = vpack.c.bf16 %v569_v23, %v568_v21  ;;  %v907_v28 = vpack.c.bf16 %v585_v24, %v584_v22 }
 0x10c   :  { %928 = vst [vmem:[%s1327_s3 + $0x28] sm:$0xff] %v872_v25   ;;  %936 = vst [vmem:[%s1327_s3 + $0x68] sm:$0xff] %v912_v26  }
 0x10d   :  { %927 = vst [vmem:[%s1327_s3 + $0x20] sm:$0xff] %v867_v27   ;;  %935 = vst [vmem:[%s1327_s3 + $0x60] sm:$0xff] %v907_v28   ;;  %v993_v1 = vpop.f32.mrb[12].mxu0  ;;  %v1009_v2 = vpop.f32.mrb[12].mxu1 }
 0x10e   :  { %v289_v3 = vpop.f32.mrb[13].mxu0  ;;  %v353_v17 = vpop.f32.mrb[13].mxu1  ;;  %v574_v31 = vmul.f32 %v993_v1, %v1259_v8  ;;  %v590_v32 = vmul.f32 %v1009_v2, %v553_v4 }
 0x10f   :  { %v994_v18 = vpop.f32.mrb[14].mxu0  ;;  %v1010_v30 = vpop.f32.mrb[14].mxu1  ;;  %v572_v37 = vmul.f32 %v1255_v6, %v289_v3  ;;  %v588_v38 = vmul.f32 %v543_v10, %v353_v17 }
 0x110   :  { %v575_v33 = vmul.f32 %v994_v18, %v1257_v7  ;;  %v591_v34 = vmul.f32 %v1010_v30, %v558_v29  ;;  %v292_v35 = vpop.f32.mrb[15].mxu0  ;;  %v356_v36 = vpop.f32.mrb[15].mxu1 }
 0x111   :  { %v573_v39 = vmul.f32 %v1253_v5, %v292_v35  ;;  %v589_v40 = vmul.f32 %v548_v9, %v356_v36 }
 0x112   :  { %v882_v41 = vpack.c.bf16 %v575_v33, %v574_v31  ;;  %v922_v42 = vpack.c.bf16 %v591_v34, %v590_v32 }
 0x113   :  { %v877_v43 = vpack.c.bf16 %v573_v39, %v572_v37  ;;  %v917_v44 = vpack.c.bf16 %v589_v40, %v588_v38 }
 0x114   :  { %930 = vst [vmem:[%s1327_s3 + $0x38] sm:$0xff] %v882_v41   ;;  %938 = vst [vmem:[%s1327_s3 + $0x78] sm:$0xff] %v922_v42  }
 0x115   :  { %929 = vst [vmem:[%s1327_s3 + $0x30] sm:$0xff] %v877_v43   ;;  %937 = vst [vmem:[%s1327_s3 + $0x70] sm:$0xff] %v917_v44  }

// kernel: gcn_wrapper_forward.7
= control target key start
LH: loop header
LB: loop body
LE: loop exit
PB: predicated region body
PF: predicated region fallthrough
CT: control target
= control target key end

     0   :  { %s1111_s15 = smov 0   ;;  %s1113_s16 = smov 0   ;;  %s1290_s0 = inlined_call_operand.vmem [shape: bf16[256,256], index: 0, kind: input, shape index: {}]   ;;  %s1291_s1 = inlined_call_operand.vmem [shape: bf16[256,128], index: 1, kind: input, shape index: {}]   ;;  %s1292_s2 = inlined_call_operand.vmem [shape: f32[256,1], index: 2, kind: input, shape index: {}]   ;;  %s1293_s3 = inlined_call_operand.vmem [shape: f32[1,128], index: 3, kind: input, shape index: {}]   ;;  %s1294_s4 = inlined_call_operand.vmem [shape: f32[256,128], index: 4, kind: output, shape index: {}]  }
   0x1   :  { %s1115_s17 = smov 0  }
   0x2 LB: > { %s23_s18 = sadd.s32 1, %s1079_s16  ;;  %p870_p0 = scmp.ge.s32.totalorder %s1083_s17, 1  ;;  %s1083_s17 = sphi %s1115_s17, %s14_s17   ;;  %s1079_s16 = sphi %s1113_s16, %s1296_s16   ;;  %s1075_s15 = sphi %s1111_s15, %s1295_s15  }
   0x3   : > { %p24_p1 = scmp.ge.s32.totalorder %s23_s18, 2  ;;  %p206_p2 = scmp.lt.s32.totalorder %s1083_s17, 3 }
   0x5   : > { %s1298_s18 = smov (%p24_p1, %s23_s18), 0  ;;  %p207_p3 = pnand %p870_p0, %p206_p2 }
   0x6   : > { %v1021_v0 = vld [vmem:[%s1291_s1 + $0x40] sm:$0xff] (!%p207_p3)   ;;  %s871_s21 = sshll.u32 (!%p207_p3), %s1075_s15, 4  ;;  %v1023_v2 = vld [vmem:[%s1291_s1 + $0x48] sm:$0xff] (!%p207_p3)   ;;  %v1025_v4 = vld [vmem:[%s1291_s1 + $0x50] sm:$0xff] (!%p207_p3)   ;;  %v1085_v5 = vmov (!%p207_p3), 0  }
   0x7   : > { %210 = sbr.rel (%p207_p3) target bundleno = 285 (0x11d), region = 36  ;;  %v1022_v1 = vld [vmem:[%s1291_s1] sm:$0xff] (!%p207_p3)   ;;  %914 = vmatprep.subr.bf16.mxu0 (!%p207_p3), %v1021_v0  ;;  %978 = vmatprep.subr.bf16.mxu1 (!%p207_p3), %v1021_v0  ;;  %v1024_v3 = vld [vmem:[%s1291_s1 + $0x8] sm:$0xff] (!%p207_p3)   ;;  %p249_p4 = scmp.lt.s32.totalorder (!%p207_p3), %s871_s21, 31  ;;  %v1026_v6 = vld [vmem:[%s1291_s1 + $0x10] sm:$0xff] (!%p207_p3)  }
   0x8   : > { %915 = vmatpush3.bf16.msra.mxu0 (!%p207_p3), %v1022_v1  ;;  %986 = vmatpush3.bf16.msra.mxu1 (!%p207_p3), %v1022_v1  ;;  %v1027_v7 = vld [vmem:[%s1291_s1 + $0x58] sm:$0xff] (!%p207_p3)   ;;  %v1029_v9 = vld [vmem:[%s1291_s1 + $0x60] sm:$0xff] (!%p207_p3)   ;;  %v1031_v11 = vld [vmem:[%s1291_s1 + $0x68] sm:$0xff] (!%p207_p3)  }
   0x9   : > { %916 = vmatprep.subr.bf16.mxu0 (!%p207_p3), %v1023_v2  ;;  %979 = vmatprep.subr.bf16.mxu1 (!%p207_p3), %v1023_v2  ;;  %v1028_v8 = vld [vmem:[%s1291_s1 + $0x18] sm:$0xff] (!%p207_p3)   ;;  %v1030_v10 = vld [vmem:[%s1291_s1 + $0x20] sm:$0xff] (!%p207_p3)   ;;  %v1032_v14 = vld [vmem:[%s1291_s1 + $0x28] sm:$0xff] (!%p207_p3)  }
   0xa   : > { %1020 = vset.pattern.permute.xlu1 (!%p207_p3), %v1085_v5  ;;  %1019 = vset.pattern.permute.xlu0 (!%p207_p3), %v1085_v5  ;;  %v1033_v15 = vld [vmem:[%s1291_s1 + $0x70] sm:$0xff] (!%p207_p3)   ;;  %v1035_v17 = vld [vmem:[%s1291_s1 + $0x78] sm:$0xff] (!%p207_p3)   ;;  %v1237_v2 = vld [vmem:[%s1293_s3] ss:$0 sm:$0xff] (!%p207_p3) }
   0xb   : > { %v1034_v16 = vld [vmem:[%s1291_s1 + $0x30] sm:$0xff] (!%p207_p3)   ;;  %v1036_v19 = vld [vmem:[%s1291_s1 + $0x38] sm:$0xff] (!%p207_p3)  }
   0xc   : > { %917 = vmatpush3.bf16.msra.mxu0 (!%p207_p3), %v1024_v3  ;;  %987 = vmatpush3.bf16.msra.mxu1 (!%p207_p3), %v1024_v3 }
   0xd   : > { %918 = vmatprep.subr.bf16.mxu0 (!%p207_p3), %v1025_v4  ;;  %980 = vmatprep.subr.bf16.mxu1 (!%p207_p3), %v1025_v4 }
   0xe   : > { %s1300_s21 = smov (!%p249_p4, %s871_s21), 31 }
   0xf   : > { %s1156_s10 = sshll.u32 %s1300_s21, 3 }
  0x10   : > { %919 = vmatpush3.bf16.msra.mxu0 %v1026_v6  ;;  %988 = vmatpush3.bf16.msra.mxu1 %v1026_v6  ;;  %s1165_s15 = scalar_lea.vmem %s1290_s0, %s1156_s10  ;;  %s1188_s5 = scalar_lea.vmem %s1292_s2, %s1156_s10 }
  0x11   : > { %920 = vmatprep.subr.bf16.mxu0 %v1027_v7  ;;  %981 = vmatprep.subr.bf16.mxu1 %v1027_v7  ;;  %v1039_v12 = vld [vmem:[%s1165_s15 + $0x4] ss:$8 sps:$4 sm:$0xff]   ;;  %v601_v18 = vld [vmem:[%s1188_s5 + $0x10] sm:$0xff]  ;;  %v1037_v21 = vld [vmem:[%s1165_s15] ss:$8 sps:$4 sm:$0xff]  }
  0x12   : > { %v1042_v13 = vld [vmem:[%s1165_s15 + $0x44] ss:$8 sps:$4 sm:$0xff]   ;;  %534 = vmatprep.mubr.bf16.mxu0 %v1039_v12  ;;  %627 = vperm.xlu1 %1020, %v601_v18   ;;  %v1040_v22 = vld [vmem:[%s1165_s15 + $0x40] ss:$8 sps:$4 sm:$0xff]   ;;  %v602_v23 = vld [vmem:[%s1188_s5 + $0x18] sm:$0xff] }
  0x13   : > { %566 = vmatprep.mubr.bf16.mxu1 %v1042_v13  ;;  %v599_v20 = vld [vmem:[%s1188_s5] sm:$0xff]  ;;  %v600_v24 = vld [vmem:[%s1188_s5 + $0x8] sm:$0xff]  ;;  %v1043_v25 = vld [vmem:[%s1165_s15 + $0x14] ss:$8 sps:$4 sm:$0xff]  }
  0x14   : > { %921 = vmatpush3.bf16.msra.mxu0 %v1028_v8  ;;  %989 = vmatpush3.bf16.msra.mxu1 %v1028_v8  ;;  %v1045_v26 = vld [vmem:[%s1165_s15 + $0x54] ss:$8 sps:$4 sm:$0xff]   ;;  %v604_v27 = vld [vmem:[%s1188_s5 + $0x28] sm:$0xff]  ;;  %v603_v28 = vld [vmem:[%s1188_s5 + $0x20] sm:$0xff] }
  0x15   : > { %922 = vmatprep.subr.bf16.mxu0 %v1029_v9  ;;  %982 = vmatprep.subr.bf16.mxu1 %v1029_v9  ;;  %v1047_v29 = vld [vmem:[%s1165_s15 + $0x10] ss:$8 sps:$4 sm:$0xff]   ;;  %v1049_v33 = vld [vmem:[%s1165_s15 + $0x24] ss:$8 sps:$4 sm:$0xff]   ;;  %v1053_v37 = vld [vmem:[%s1165_s15 + $0x20] ss:$8 sps:$4 sm:$0xff]  }
  0x16   : > { %617 = vperm.xlu0 %1019, %v599_v20   ;;  %632 = vperm.xlu1 %1020, %v602_v23   ;;  %v1048_v30 = vld [vmem:[%s1165_s15 + $0x50] ss:$8 sps:$4 sm:$0xff]   ;;  %v1051_v34 = vld [vmem:[%s1165_s15 + $0x64] ss:$8 sps:$4 sm:$0xff]   ;;  %v1054_v38 = vld [vmem:[%s1165_s15 + $0x60] ss:$8 sps:$4 sm:$0xff]  }
  0x17   : > { %v606_v31 = vld [vmem:[%s1188_s5 + $0x38] sm:$0xff]  ;;  %v605_v32 = vld [vmem:[%s1188_s5 + $0x30] sm:$0xff]  ;;  %v608_v35 = vld [vmem:[%s1188_s5 + $0x48] sm:$0xff] }
  0x18   : > { %923 = vmatpush3.bf16.msra.mxu0 %v1030_v10  ;;  %990 = vmatpush3.bf16.msra.mxu1 %v1030_v10  ;;  %v607_v36 = vld [vmem:[%s1188_s5 + $0x40] sm:$0xff]  ;;  %v610_v39 = vld [vmem:[%s1188_s5 + $0x58] sm:$0xff]  ;;  %v609_v40 = vld [vmem:[%s1188_s5 + $0x50] sm:$0xff] }
  0x19   : > { %924 = vmatprep.subr.bf16.mxu0 %v1031_v11  ;;  %983 = vmatprep.subr.bf16.mxu1 %v1031_v11  ;;  %v1055_v41 = vld [vmem:[%s1165_s15 + $0x34] ss:$8 sps:$4 sm:$0xff]   ;;  %v612_v43 = vld [vmem:[%s1188_s5 + $0x68] sm:$0xff]  ;;  %v611_v44 = vld [vmem:[%s1188_s5 + $0x60] sm:$0xff] }
  0x1a   : > { %622 = vperm.xlu0 %1019, %v600_v24   ;;  %642 = vperm.xlu1 %1020, %v604_v27   ;;  %v1057_v42 = vld [vmem:[%s1165_s15 + $0x74] ss:$8 sps:$4 sm:$0xff]   ;;  %v1059_v45 = vld [vmem:[%s1165_s15 + $0x30] ss:$8 sps:$4 sm:$0xff]  }
  0x1b   : > { %v1060_v46 = vld [vmem:[%s1165_s15 + $0x70] ss:$8 sps:$4 sm:$0xff]   ;;  %s1243_s15 = scalar_lea.vmem %s1294_s4, %s1156_s10 }
  0x1c   : > { %925 = vmatpush3.bf16.msra.mxu0 %v1032_v14  ;;  %991 = vmatpush3.bf16.msra.mxu1 %v1032_v14  ;;  %v614_v47 = vld [vmem:[%s1188_s5 + $0x78] sm:$0xff]  ;;  %v613_v48 = vld [vmem:[%s1188_s5 + $0x70] sm:$0xff] }
  0x1d   : > { %926 = vmatprep.subr.bf16.mxu0 %v1033_v15  ;;  %984 = vmatprep.subr.bf16.mxu1 %v1033_v15 }
  0x1e   : > { %637 = vperm.xlu0 %1019, %v603_v28   ;;  %652 = vperm.xlu1 %1020, %v606_v31  }
  0x20   : > { %927 = vmatpush3.bf16.msra.mxu0 %v1034_v16  ;;  %992 = vmatpush3.bf16.msra.mxu1 %v1034_v16 }
  0x21   : > { %928 = vmatprep.subr.bf16.mxu0 %v1035_v17  ;;  %985 = vmatprep.subr.bf16.mxu1 %v1035_v17 }
  0x22   : > { %647 = vperm.xlu0 %1019, %v605_v32   ;;  %662 = vperm.xlu1 %1020, %v608_v35  }
  0x24   : > { %929 = vmatpush3.bf16.msra.mxu0 %v1036_v19  ;;  %993 = vmatpush3.bf16.msra.mxu1 %v1036_v19 }
  0x26   : > { %657 = vperm.xlu0 %1019, %v607_v36   ;;  %672 = vperm.xlu1 %1020, %v610_v39  }
  0x27   : > { %535 = vmatmul.mubr.bf16.vlgmr.msra.gmra.mrb[0].mxu0 %v1037_v21  ;;  %567 = vmatmul.mubr.bf16.vlgmr.msra.gmra.mrb[0].mxu1 %v1040_v22 }
  0x28   : > { %542 = vmatprep.mubr.bf16.mxu0 %v1043_v25  ;;  %574 = vmatprep.mubr.bf16.mxu1 %v1045_v26 }
  0x2a   : > { %667 = vperm.xlu0 %1019, %v609_v40   ;;  %682 = vperm.xlu1 %1020, %v612_v43  }
  0x2e   : > { %677 = vperm.xlu0 %1019, %v611_v44   ;;  %692 = vperm.xlu1 %1020, %v614_v47  }
  0x2f   : > { %543 = vmatmul.mubr.bf16.gmra.mrb[4].mxu0 %v1047_v29  ;;  %575 = vmatmul.mubr.bf16.gmra.mrb[4].mxu1 %v1048_v30 }
  0x30   : > { %550 = vmatprep.mubr.bf16.mxu0 %v1049_v33  ;;  %582 = vmatprep.mubr.bf16.mxu1 %v1051_v34 }
  0x32   : > { %687 = vperm.xlu0 %1019, %v613_v48  }
  0x37   : > { %551 = vmatmul.mubr.bf16.gmra.mrb[8].mxu0 %v1053_v37  ;;  %583 = vmatmul.mubr.bf16.gmra.mrb[8].mxu1 %v1054_v38 }
  0x38   : > { %558 = vmatprep.mubr.bf16.mxu0 %v1055_v41  ;;  %590 = vmatprep.mubr.bf16.mxu1 %v1057_v42 }
  0x3f   : > { %559 = vmatmul.mubr.bf16.gmra.mrb[12].mxu0 %v1059_v45  ;;  %591 = vmatmul.mubr.bf16.gmra.mrb[12].mxu1 %v1060_v46 }
  0x91   : > { %v628_v50 = vpop.permute.xlu1 %627 }
  0x95   : > { %v618_v49 = vpop.permute.xlu0 %617  ;;  %v633_v52 = vpop.permute.xlu1 %632 }
  0x99   : > { %v623_v51 = vpop.permute.xlu0 %622  ;;  %v1228_v54 = vpop.permute.xlu1 %642 }
  0x9d   : > { %v1226_v53 = vpop.permute.xlu0 %637  ;;  %v1232_v56 = vpop.permute.xlu1 %652 }
  0xa1   : > { %v1230_v55 = vpop.permute.xlu0 %647  ;;  %v663_v9 = vpop.permute.xlu1 %662 }
  0xa5   : > { %v658_v57 = vpop.permute.xlu0 %657  ;;  %v673_v31 = vpop.permute.xlu1 %672 }
  0xa9   : > { %v668_v14 = vpop.permute.xlu0 %667 }
  0xad   : > { %v678_v36 = vpop.permute.xlu0 %677 }
  0xfa   : > { %v930_v58 = vpop.f32.mrb[0].mxu0  ;;  %v954_v59 = vpop.f32.mrb[0].mxu1 }
  0xfb   : > { %v931_v60 = vpop.f32.mrb[1].mxu0  ;;  %v955_v61 = vpop.f32.mrb[1].mxu1 }
  0xfc   : > { %v932_v62 = vadd.f32 %v931_v60, %v930_v58  ;;  %v956_v63 = vadd.f32 %v955_v61, %v954_v59  ;;  %v933_v0 = vpop.f32.mrb[2].mxu0  ;;  %v957_v1 = vpop.f32.mrb[2].mxu1 }
  0xfd   : > { %v934_v3 = vpop.f32.mrb[3].mxu0  ;;  %v958_v4 = vpop.f32.mrb[3].mxu1 }
  0xfe   : > { %v695_v5 = vmul.f32 %v932_v62, %v618_v49  ;;  %v703_v6 = vmul.f32 %v956_v63, %v658_v57  ;;  %v935_v7 = vadd.f32 %v934_v3, %v933_v0  ;;  %v959_v8 = vadd.f32 %v958_v4, %v957_v1  ;;  %v683_v57 = vpop.permute.xlu1 %682  ;;  %v688_v62 = vpop.permute.xlu0 %687 }
 0x100   : > { %v718_v10 = vadd.f32 %v1237_v2, %v695_v5  ;;  %v726_v11 = vadd.f32 %v1237_v2, %v703_v6  ;;  %v696_v12 = vmul.f32 %v935_v7, %v623_v51  ;;  %v704_v13 = vmul.f32 %v959_v8, %v663_v9 }
 0x102   : > { %734 = vst [vmem:[%s1243_s15] sm:$0xff] %v718_v10  ;;  %742 = vst [vmem:[%s1243_s15 + $0x40] sm:$0xff] %v726_v11  ;;  %v719_v15 = vadd.f32 %v1237_v2, %v696_v12  ;;  %v727_v16 = vadd.f32 %v1237_v2, %v704_v13  ;;  %v936_v17 = vpop.f32.mrb[4].mxu0  ;;  %v960_v18 = vpop.f32.mrb[4].mxu1 }
 0x103   : > { %v937_v19 = vpop.f32.mrb[5].mxu0  ;;  %v961_v20 = vpop.f32.mrb[5].mxu1 }
 0x104   : > { %735 = vst [vmem:[%s1243_s15 + $0x8] sm:$0xff] %v719_v15  ;;  %743 = vst [vmem:[%s1243_s15 + $0x48] sm:$0xff] %v727_v16  ;;  %v938_v21 = vadd.f32 %v937_v19, %v936_v17  ;;  %v962_v22 = vadd.f32 %v961_v20, %v960_v18  ;;  %v939_v23 = vpop.f32.mrb[6].mxu0  ;;  %v963_v24 = vpop.f32.mrb[6].mxu1 }
 0x105   : > { %v940_v25 = vpop.f32.mrb[7].mxu0  ;;  %v964_v26 = vpop.f32.mrb[7].mxu1 }
 0x106   : > { %v697_v27 = vmul.f32 %v938_v21, %v628_v50  ;;  %v705_v28 = vmul.f32 %v962_v22, %v668_v14  ;;  %v941_v29 = vadd.f32 %v940_v25, %v939_v23  ;;  %v965_v30 = vadd.f32 %v964_v26, %v963_v24  ;;  %v693_v14 = vpop.permute.xlu1 %692 }
 0x108   : > { %v720_v32 = vadd.f32 %v1237_v2, %v697_v27  ;;  %v728_v33 = vadd.f32 %v1237_v2, %v705_v28  ;;  %v698_v34 = vmul.f32 %v941_v29, %v633_v52  ;;  %v706_v35 = vmul.f32 %v965_v30, %v673_v31 }
 0x10a   : > { %736 = vst [vmem:[%s1243_s15 + $0x10] sm:$0xff] %v720_v32  ;;  %744 = vst [vmem:[%s1243_s15 + $0x50] sm:$0xff] %v728_v33  ;;  %v721_v37 = vadd.f32 %v1237_v2, %v698_v34  ;;  %v729_v38 = vadd.f32 %v1237_v2, %v706_v35  ;;  %v942_v39 = vpop.f32.mrb[8].mxu0  ;;  %v966_v40 = vpop.f32.mrb[8].mxu1 }
 0x10b   : > { %v943_v41 = vpop.f32.mrb[9].mxu0  ;;  %v967_v42 = vpop.f32.mrb[9].mxu1 }
 0x10c   : > { %737 = vst [vmem:[%s1243_s15 + $0x18] sm:$0xff] %v721_v37  ;;  %745 = vst [vmem:[%s1243_s15 + $0x58] sm:$0xff] %v729_v38  ;;  %v944_v43 = vadd.f32 %v943_v41, %v942_v39  ;;  %v968_v44 = vadd.f32 %v967_v42, %v966_v40  ;;  %v945_v45 = vpop.f32.mrb[10].mxu0  ;;  %v969_v46 = vpop.f32.mrb[10].mxu1 }
 0x10d   : > { %v946_v47 = vpop.f32.mrb[11].mxu0  ;;  %v970_v48 = vpop.f32.mrb[11].mxu1 }
 0x10e   : > { %v699_v49 = vmul.f32 %v944_v43, %v1226_v53  ;;  %v707_v50 = vmul.f32 %v968_v44, %v678_v36  ;;  %v947_v51 = vadd.f32 %v946_v47, %v945_v45  ;;  %v971_v52 = vadd.f32 %v970_v48, %v969_v46 }
 0x110   : > { %v722_v58 = vadd.f32 %v1237_v2, %v699_v49  ;;  %v730_v59 = vadd.f32 %v1237_v2, %v707_v50  ;;  %v700_v60 = vmul.f32 %v947_v51, %v1228_v54  ;;  %v708_v61 = vmul.f32 %v971_v52, %v683_v57 }
 0x112   : > { %738 = vst [vmem:[%s1243_s15 + $0x20] sm:$0xff] %v722_v58  ;;  %746 = vst [vmem:[%s1243_s15 + $0x60] sm:$0xff] %v730_v59  ;;  %v723_v63 = vadd.f32 %v1237_v2, %v700_v60  ;;  %v731_v53 = vadd.f32 %v1237_v2, %v708_v61  ;;  %v948_v0 = vpop.f32.mrb[12].mxu0  ;;  %v972_v1 = vpop.f32.mrb[12].mxu1 }
 0x113   : > { %v949_v3 = vpop.f32.mrb[13].mxu0  ;;  %v973_v4 = vpop.f32.mrb[13].mxu1 }
 0x114   : > { %739 = vst [vmem:[%s1243_s15 + $0x28] sm:$0xff] %v723_v63  ;;  %747 = vst [vmem:[%s1243_s15 + $0x68] sm:$0xff] %v731_v53  ;;  %v950_v5 = vadd.f32 %v949_v3, %v948_v0  ;;  %v974_v6 = vadd.f32 %v973_v4, %v972_v1  ;;  %v951_v7 = vpop.f32.mrb[14].mxu0  ;;  %v975_v54 = vpop.f32.mrb[14].mxu1 }
 0x115   : > { %v952_v8 = vpop.f32.mrb[15].mxu0  ;;  %v976_v9 = vpop.f32.mrb[15].mxu1 }
 0x116   : > { %v701_v10 = vmul.f32 %v950_v5, %v1230_v55  ;;  %v709_v11 = vmul.f32 %v974_v6, %v688_v62  ;;  %v953_v12 = vadd.f32 %v952_v8, %v951_v7  ;;  %v977_v13 = vadd.f32 %v976_v9, %v975_v54 }
 0x118   : > { %v724_v15 = vadd.f32 %v1237_v2, %v701_v10  ;;  %v732_v16 = vadd.f32 %v1237_v2, %v709_v11  ;;  %v702_v17 = vmul.f32 %v953_v12, %v1232_v56  ;;  %v710_v18 = vmul.f32 %v977_v13, %v693_v14 }
 0x11a   : > { %740 = vst [vmem:[%s1243_s15 + $0x30] sm:$0xff] %v724_v15  ;;  %748 = vst [vmem:[%s1243_s15 + $0x70] sm:$0xff] %v732_v16  ;;  %v725_v19 = vadd.f32 %v1237_v2, %v702_v17  ;;  %v733_v20 = vadd.f32 %v1237_v2, %v710_v18 }
 0x11c   : > { %741 = vst [vmem:[%s1243_s15 + $0x38] sm:$0xff] %v725_v19  ;;  %749 = vst [vmem:[%s1243_s15 + $0x78] sm:$0xff] %v733_v20 }
 0x11d PF: > { %s14_s17 = sadd.s32 1, %s1083_s17   ;;  %s1295_s15 = smov %s1079_s16 }
 0x11e   : > { %p11_p5 = scmp.ge.s32.totalorder %s14_s17, 4   ;;  %s1296_s16 = smov %s1298_s18 }
 0x120   :  { %13 = sbr.rel (!%p11_p5) target bundleno = 2 (0x2), region = 75 }

</bundles_post_ra>
